<compile_context>
chip_gen: v6e
topology: v6e:2x2x1
jax: 0.10.0
libtpu: 0.0.40
codegen_flags: <defaults>
</compile_context>

<pallas_src>
import functools

import jax
import jax.numpy as jnp
from jax.experimental import pallas as pl
from jax.experimental.pallas import tpu as pltpu

_COMPUTE_DTYPE = jnp.bfloat16          # matmul operand / activation dtype
_VMEM_LIMIT = 32 * 1024 * 1024         # safe on v5e/v6e (128 MiB) and v7x (64 MiB)
_MAX_SINGLE_K = 2048                   # K up to this -> single K-tile (enables LN fusion)
_LN_EPS = 1e-5


def _round_up(x, m):
    return (x + m - 1) // m * m


def _fit_tile(dim, target, align):
    """Pick (tile, padded_dim).

    If dim <= target the block spans the full dim (allowed by the (8,128)
    rule).  Otherwise prefer the largest `align`-multiple <= target that
    divides dim exactly (no padding); fall back to target + zero padding.
    """
    if dim <= target:
        return dim, dim
    t = (target // align) * align
    while t >= align:
        if dim % t == 0:
            return t, dim
        t -= align
    return target, _round_up(dim, target)


# ------------------------------- linear kernels ------------------------------

def _linear_single_k_kernel(*refs, act, has_bias, has_residual, fuse_ln, eps):
    """Single K-tile: y = act(LN?(x) @ w + b) [+ residual], no scratch."""
    it = iter(refs)
    x_ref = next(it)
    g_ref = next(it) if fuse_ln else None
    bb_ref = next(it) if fuse_ln else None
    w_ref = next(it)
    b_ref = next(it) if has_bias else None
    r_ref = next(it) if has_residual else None
    o_ref = next(it)

    x = x_ref[...]
    if fuse_ln:
        xf = x.astype(jnp.float32)
        mu = jnp.mean(xf, axis=-1, keepdims=True)
        xc = xf - mu
        var = jnp.mean(xc * xc, axis=-1, keepdims=True)
        xf = xc * jax.lax.rsqrt(var + eps)
        xf = xf * g_ref[...].astype(jnp.float32) + bb_ref[...].astype(jnp.float32)
        x = xf.astype(x_ref.dtype)

    acc = jnp.dot(x, w_ref[...], preferred_element_type=jnp.float32)
    if has_bias:
        acc = acc + b_ref[...].astype(jnp.float32)
    if act == "quick_gelu":
        acc = acc * jax.nn.sigmoid(1.702 * acc)   # CLIP QuickGELU
    if has_residual:
        acc = acc + r_ref[...].astype(jnp.float32)
    o_ref[...] = acc.astype(o_ref.dtype)


def _linear_multi_k_kernel(*refs, act, has_bias, has_residual):
    """Multi K-tile: f32 VMEM accumulator, epilogue fused at last k step."""
    it = iter(refs)
    x_ref = next(it)
    w_ref = next(it)
    b_ref = next(it) if has_bias else None
    r_ref = next(it) if has_residual else None
    o_ref = next(it)
    acc_ref = next(it)

    k = pl.program_id(2)

    @pl.when(k == 0)
    def _():
        acc_ref[...] = jnp.zeros_like(acc_ref)

    acc_ref[...] += jnp.dot(x_ref[...], w_ref[...],
                            preferred_element_type=jnp.float32)

    @pl.when(k == pl.num_programs(2) - 1)
    def _():
        acc = acc_ref[...]
        if has_bias:
            acc = acc + b_ref[...].astype(jnp.float32)
        if act == "quick_gelu":
            acc = acc * jax.nn.sigmoid(1.702 * acc)
        if has_residual:
            acc = acc + r_ref[...].astype(jnp.float32)
        o_ref[...] = acc.astype(o_ref.dtype)


def linear(x, w, b=None, act="none", residual=None, ln=None, eps=_LN_EPS,
           out_dtype=None, tm=256, tn=512, tk=512):
    """y = act(LN?(x) @ w + b) [+ residual].

    x:[M,K] w:[K,N] b:[N] residual:[M,N] ln:(gamma[K], beta[K]) or None.
    Operands are cast to bf16 (f32 accumulation on the MXU); LayerNorm, bias,
    QuickGELU and the residual add are fused into the kernel.
    """
    assert act in ("none", "quick_gelu")
    M, K = x.shape
    K2, N = w.shape
    assert K == K2
    out_dtype = out_dtype if out_dtype is not None else _COMPUTE_DTYPE

    # LN fusion requires the whole K dim resident per block.
    if ln is not None and K > _MAX_SINGLE_K:
        gamma, beta = ln
        x = layer_norm(x, gamma, beta, eps=eps, out_dtype=_COMPUTE_DTYPE)
        ln = None
    single_k = K <= _MAX_SINGLE_K
    fuse_ln = ln is not None
    has_bias = b is not None
    has_residual = residual is not None

    tm, Mp = _fit_tile(M, tm, 8)
    tn, Np = _fit_tile(N, tn, 128)
    if single_k:
        tk_eff, Kp = K, K
    else:
        tk_eff, Kp = _fit_tile(K, tk, 128)

    xp = x.astype(_COMPUTE_DTYPE)
    wp = w.astype(_COMPUTE_DTYPE)
    if (Mp, Kp) != (M, K):
        xp = jnp.pad(xp, ((0, Mp - M), (0, Kp - K)))
    if (Kp, Np) != (K, N):
        wp = jnp.pad(wp, ((0, Kp - K), (0, Np - N)))

    in_arrays = [xp]
    if single_k:
        in_specs = [pl.BlockSpec((tm, Kp), lambda i, j: (i, 0))]
        if fuse_ln:
            gamma, beta = ln
            in_arrays += [gamma.reshape(1, K).astype(jnp.float32),
                          beta.reshape(1, K).astype(jnp.float32)]
            in_specs += [pl.BlockSpec((1, Kp), lambda i, j: (0, 0)),
                         pl.BlockSpec((1, Kp), lambda i, j: (0, 0))]
        in_arrays.append(wp)
        in_specs.append(pl.BlockSpec((Kp, tn), lambda i, j: (0, j)))
        if has_bias:
            bp = b.astype(jnp.float32)
            if Np != N:
                bp = jnp.pad(bp, (0, Np - N))
            in_arrays.append(bp.reshape(1, Np))
            in_specs.append(pl.BlockSpec((1, tn), lambda i, j: (0, j)))
        if has_residual:
            rp = residual
            if (Mp, Np) != (M, N):
                rp = jnp.pad(rp, ((0, Mp - M), (0, Np - N)))
            in_arrays.append(rp)
            in_specs.append(pl.BlockSpec((tm, tn), lambda i, j: (i, j)))

        out = pl.pallas_call(
            functools.partial(_linear_single_k_kernel, act=act,
                              has_bias=has_bias, has_residual=has_residual,
                              fuse_ln=fuse_ln, eps=eps),
            out_shape=jax.ShapeDtypeStruct((Mp, Np), out_dtype),
            grid=(Mp // tm, Np // tn),
            in_specs=in_specs,
            out_specs=pl.BlockSpec((tm, tn), lambda i, j: (i, j)),
            compiler_params=pltpu.CompilerParams(
                dimension_semantics=("parallel", "parallel"),
                vmem_limit_bytes=_VMEM_LIMIT),
        )(*in_arrays)
    else:
        in_arrays.append(wp)
        in_specs = [pl.BlockSpec((tm, tk_eff), lambda i, j, k: (i, k)),
                    pl.BlockSpec((tk_eff, tn), lambda i, j, k: (k, j))]
        if has_bias:
            bp = b.astype(jnp.float32)
            if Np != N:
                bp = jnp.pad(bp, (0, Np - N))
            in_arrays.append(bp.reshape(1, Np))
            in_specs.append(pl.BlockSpec((1, tn), lambda i, j, k: (0, j)))
        if has_residual:
            rp = residual
            if (Mp, Np) != (M, N):
                rp = jnp.pad(rp, ((0, Mp - M), (0, Np - N)))
            in_arrays.append(rp)
            in_specs.append(pl.BlockSpec((tm, tn), lambda i, j, k: (i, j)))

        out = pl.pallas_call(
            functools.partial(_linear_multi_k_kernel, act=act,
                              has_bias=has_bias, has_residual=has_residual),
            out_shape=jax.ShapeDtypeStruct((Mp, Np), out_dtype),
            grid=(Mp // tm, Np // tn, Kp // tk_eff),
            in_specs=in_specs,
            out_specs=pl.BlockSpec((tm, tn), lambda i, j, k: (i, j)),
            scratch_shapes=[pltpu.VMEM((tm, tn), jnp.float32)],
            compiler_params=pltpu.CompilerParams(
                dimension_semantics=("parallel", "parallel", "arbitrary"),
                vmem_limit_bytes=_VMEM_LIMIT),
        )(*in_arrays)

    if (Mp, Np) != (M, N):
        out = out[:M, :N]
    return out


# ------------------------------ LayerNorm kernel -----------------------------

def _ln_kernel(x_ref, g_ref, b_ref, o_ref, *, eps):
    x = x_ref[...].astype(jnp.float32)
    mu = jnp.mean(x, axis=-1, keepdims=True)
    xc = x - mu
    var = jnp.mean(xc * xc, axis=-1, keepdims=True)
    y = xc * jax.lax.rsqrt(var + eps)
    y = y * g_ref[...].astype(jnp.float32) + b_ref[...].astype(jnp.float32)
    o_ref[...] = y.astype(o_ref.dtype)


def layer_norm(x, gamma, beta, eps=_LN_EPS, out_dtype=None, block_rows=512):
    """x: [M, C] normalized over last dim (nn.LayerNorm(C)); row-tiled."""
    M, C = x.shape
    out_dtype = out_dtype if out_dtype is not None else x.dtype
    tm, Mp = _fit_tile(M, block_rows, 8)
    xp = x if Mp == M else jnp.pad(x, ((0, Mp - M), (0, 0)))

    out = pl.pallas_call(
        functools.partial(_ln_kernel, eps=eps),
        out_shape=jax.ShapeDtypeStruct((Mp, C), out_dtype),
        grid=(Mp // tm,),
        in_specs=[
            pl.BlockSpec((tm, C), lambda i: (i, 0)),
            pl.BlockSpec((1, C), lambda i: (0, 0)),
            pl.BlockSpec((1, C), lambda i: (0, 0)),
        ],
        out_specs=pl.BlockSpec((tm, C), lambda i: (i, 0)),
        compiler_params=pltpu.CompilerParams(
            dimension_semantics=("parallel",),
            vmem_limit_bytes=_VMEM_LIMIT),
    )(xp,
      gamma.reshape(1, C).astype(jnp.float32),
      beta.reshape(1, C).astype(jnp.float32))

    return out[:M] if Mp != M else out


# ------------------------------ attention kernel -----------------------------

def _attn_kernel(qkv_ref, o_ref, *, heads, width, scale):
    qkv = qkv_ref[0]                               # [S, 3*width]
    Dh = width // heads
    outs = []
    for h in range(heads):                         # unrolled at trace time
        q_h = qkv[:, h * Dh:(h + 1) * Dh]
        k_h = qkv[:, width + h * Dh: width + (h + 1) * Dh]
        v_h = qkv[:, 2 * width + h * Dh: 2 * width + (h + 1) * Dh]
        s = jnp.dot(q_h, k_h.T, preferred_element_type=jnp.float32) * scale
        m = jnp.max(s, axis=-1, keepdims=True)
        p = jnp.exp(s - m)
        denom = jnp.sum(p, axis=-1, keepdims=True)
        p = p * pl.reciprocal(denom, approx=True)
        o_h = jnp.dot(p.astype(v_h.dtype), v_h,
                      preferred_element_type=jnp.float32)
        outs.append(o_h)
    o_ref[0] = jnp.concatenate(outs, axis=-1).astype(o_ref.dtype)


def mha_attention_fused(qkv, heads, scale):
    """qkv: [B, S, 3*width] (q | k | v, each head-contiguous as in PyTorch MHA).

    One grid step per batch element processes all heads and writes a
    lane-dense [B, S, width] output; no HBM round-trip for the head split.
    """
    B, S, W3 = qkv.shape
    width = W3 // 3
    return pl.pallas_call(
        functools.partial(_attn_kernel, heads=heads, width=width, scale=scale),
        out_shape=jax.ShapeDtypeStruct((B, S, width), qkv.dtype),
        grid=(B,),
        in_specs=[pl.BlockSpec((1, S, W3), lambda b: (b, 0, 0))],
        out_specs=pl.BlockSpec((1, S, width), lambda b: (b, 0, 0)),
        compiler_params=pltpu.CompilerParams(
            dimension_semantics=("parallel",),
            vmem_limit_bytes=_VMEM_LIMIT),
    )(qkv)


# --------------------------- parameter construction --------------------------

def init_params(key, *, width, layers, patch_size, num_patches, output_dim,
                param_dtype=_COMPUTE_DTYPE):
    scale = width ** (-0.5)
    keys = jax.random.split(key, 4 + layers)
    params = {
        "conv1_w": (0.02 * jax.random.normal(
            keys[0], (width, 3, patch_size, patch_size), jnp.float32)
        ).astype(param_dtype),
        "class_embedding": scale * jax.random.normal(keys[1], (width,), jnp.float32),
        "positional_embedding": scale * jax.random.normal(
            keys[2], (num_patches + 1, width), jnp.float32),
        "ln_pre": (jnp.ones((width,), jnp.float32), jnp.zeros((width,), jnp.float32)),
        "ln_post": (jnp.ones((width,), jnp.float32), jnp.zeros((width,), jnp.float32)),
        "proj": (scale * jax.random.normal(
            keys[3], (width, output_dim), jnp.float32)).astype(param_dtype),
        "blocks": [],
    }
    for l in range(layers):
        k = jax.random.split(keys[4 + l], 4)
        params["blocks"].append({
            "ln1": (jnp.ones((width,), jnp.float32), jnp.zeros((width,), jnp.float32)),
            "ln2": (jnp.ones((width,), jnp.float32), jnp.zeros((width,), jnp.float32)),
            # stored pre-transposed so forward uses x @ W
            "in_proj_w": (0.02 * jax.random.normal(
                k[0], (width, 3 * width), jnp.float32)).astype(param_dtype),
            "in_proj_b": jnp.zeros((3 * width,), jnp.float32),
            "out_proj_w": (0.02 * jax.random.normal(
                k[1], (width, width), jnp.float32)).astype(param_dtype),
            "out_proj_b": jnp.zeros((width,), jnp.float32),
            "fc_w": (0.02 * jax.random.normal(
                k[2], (width, 4 * width), jnp.float32)).astype(param_dtype),
            "fc_b": jnp.zeros((4 * width,), jnp.float32),
            "proj_w": (0.02 * jax.random.normal(
                k[3], (4 * width, width), jnp.float32)).astype(param_dtype),
            "proj_b": jnp.zeros((width,), jnp.float32),
        })
    return params


# ----------------------------------- forward ---------------------------------

def _embed_tokens(params, x, *, patch_size, width):
    """Patch-embed conv (as im2col + Pallas matmul) + class token + pos embed."""
    B, Cin, H, W = x.shape
    Hp, Wp = H // patch_size, W // patch_size
    Np = Hp * Wp
    spatial = int(round((params["positional_embedding"].shape[0] - 1) ** 0.5))

    patches = x.reshape(B, Cin, Hp, patch_size, Wp, patch_size)
    patches = patches.transpose(0, 2, 4, 1, 3, 5).reshape(
        B * Np, Cin * patch_size * patch_size)
    w_conv = params["conv1_w"].reshape(width, -1).T          # [Cin*P*P, width]
    xp = linear(patches, w_conv).astype(jnp.float32).reshape(B, Np, width)

    # matches PyTorch, including class_embedding being added twice on token 0
    cls = params["class_embedding"].astype(jnp.float32)
    x_tok = jnp.concatenate([jnp.broadcast_to(cls, (B, 1, width)), xp], axis=1)
    pos = params["positional_embedding"].astype(jnp.float32)
    cls_pos = pos[0] + cls
    spatial_pos = pos[1:]
    if (Hp, Wp) != (spatial, spatial):
        # TODO(synk): F.interpolate(bilinear, align_corners=False) equivalent;
        # done with jax.image.resize outside Pallas (pure layout/resample op).
        sp = spatial_pos.reshape(spatial, spatial, width)
        sp = jax.image.resize(sp, (Hp, Wp, width), method="bilinear")
        spatial_pos = sp.reshape(Hp * Wp, width)
    pos_full = jnp.concatenate([cls_pos[None, :], spatial_pos], axis=0)
    return x_tok + pos_full[None], Hp, Wp


def clip_vit_forward(params, x, *, patch_size, width, heads, out_indices,
                     get_embeddings=True):
    B = x.shape[0]
    head_dim = width // heads
    scale = head_dim ** (-0.5)

    x_tok, Hp, Wp = _embed_tokens(params, x, patch_size=patch_size, width=width)
    S = Hp * Wp + 1

    # ln_pre (output in bf16 for the transformer residual stream)
    g, b = params["ln_pre"]
    xcur = layer_norm(x_tok.reshape(B * S, width), g, b,
                      out_dtype=_COMPUTE_DTYPE)               # [B*S, width]

    features = []
    for i, blk in enumerate(params["blocks"]):
        # attention sub-block: x = x + attn(ln_1(x))   (drop_path rate 0 -> id)
        g1, b1 = blk["ln1"]
        qkv = linear(xcur, blk["in_proj_w"], blk["in_proj_b"], ln=(g1, b1))
        o = mha_attention_fused(qkv.reshape(B, S, 3 * width), heads, scale)
        xcur = linear(o.reshape(B * S, width),
                      blk["out_proj_w"], blk["out_proj_b"], residual=xcur)

        # mlp sub-block: x = x + mlp(ln_2(x)), mlp = fc -> QuickGELU -> proj
        g2, b2 = blk["ln2"]
        h = linear(xcur, blk["fc_w"], blk["fc_b"], act="quick_gelu", ln=(g2, b2))
        xcur = linear(h, blk["proj_w"], blk["proj_b"], residual=xcur)

        if len(out_indices) > 1 and i in out_indices:
            feat = xcur.reshape(B, S, width)[:, 1:, :].transpose(0, 2, 1)
            features.append(feat.reshape(B, width, Hp, Wp).astype(jnp.float32))

    outs = []
    if get_embeddings:
        gp, bp = params["ln_post"]
        x3 = linear(xcur, params["proj"], ln=(gp, bp), out_dtype=jnp.float32)
        out_dim = params["proj"].shape[1]
        x3 = x3.reshape(B, S, out_dim)
        global_embedding = x3[:, 0]
        visual_embedding = x3[:, 1:].reshape(B, Hp, Wp, out_dim).transpose(0, 3, 1, 2)
        if len(out_indices) == 1:
            # TODO(synk): reference divides with no epsilon; kept identical.
            visual_embedding = visual_embedding / jnp.linalg.norm(
                visual_embedding, axis=1, keepdims=True)
            features.append(visual_embedding)
        outs.append(tuple(features))
        global_embedding = global_embedding / jnp.linalg.norm(
            global_embedding, axis=1, keepdims=True)
        outs.append(global_embedding)
    return outs


# ----------------------- pure-JAX reference (for checking) -------------------

def _ref_forward(params, x, *, patch_size, width, heads, out_indices,
                 get_embeddings=True):
    cd = _COMPUTE_DTYPE

    def lnorm(a, g, bb):
        af = a.astype(jnp.float32)
        mu = af.mean(-1, keepdims=True)
        xc = af - mu
        var = (xc * xc).mean(-1, keepdims=True)
        return xc * jax.lax.rsqrt(var + _LN_EPS) * g.astype(jnp.float32) \
            + bb.astype(jnp.float32)

    def mm(a, w, b=None, act="none", residual=None, ln=None, out_dtype=cd):
        if ln is not None:
            a = lnorm(a, *ln).astype(cd)
        out = jnp.dot(a.astype(cd), w.astype(cd),
                      preferred_element_type=jnp.float32)
        if b is not None:
            out = out + b.astype(jnp.float32)
        if act == "quick_gelu":
            out = out * jax.nn.sigmoid(1.702 * out)
        if residual is not None:
            out = out + residual.astype(jnp.float32)
        return out.astype(out_dtype)

    def attn(qkv, scale):
        B, S, W3 = qkv.shape
        w_ = W3 // 3
        Dh = w_ // heads
        q = qkv[..., :w_].reshape(B, S, heads, Dh).transpose(0, 2, 1, 3)
        k = qkv[..., w_:2 * w_].reshape(B, S, heads, Dh).transpose(0, 2, 1, 3)
        v = qkv[..., 2 * w_:].reshape(B, S, heads, Dh).transpose(0, 2, 1, 3)
        s = jnp.einsum("bhqd,bhkd->bhqk", q, k,
                       preferred_element_type=jnp.float32) * scale
        p = jax.nn.softmax(s, axis=-1)
        o = jnp.einsum("bhqk,bhkd->bhqd", p.astype(cd), v,
                       preferred_element_type=jnp.float32)
        return o.transpose(0, 2, 1, 3).reshape(B, S, w_).astype(cd)

    B, Cin, H, W = x.shape
    Hp, Wp = H // patch_size, W // patch_size
    Np = Hp * Wp
    S = Np + 1
    head_dim = width // heads
    scale = head_dim ** (-0.5)

    patches = x.reshape(B, Cin, Hp, patch_size, Wp, patch_size)
    patches = patches.transpose(0, 2, 4, 1, 3, 5).reshape(
        B * Np, Cin * patch_size * patch_size)
    w_conv = params["conv1_w"].reshape(width, -1).T
    xp = mm(patches, w_conv, b=None).astype(jnp.float32).reshape(B, Np, width)

    cls = params["class_embedding"].astype(jnp.float32)
    x_tok = jnp.concatenate([jnp.broadcast_to(cls, (B, 1, width)), xp], axis=1)
    pos = params["positional_embedding"].astype(jnp.float32)
    pos_full = jnp.concatenate([(pos[0] + cls)[None, :], pos[1:]], axis=0)
    x_tok = x_tok + pos_full[None]

    g, b = params["ln_pre"]
    xcur = lnorm(x_tok.reshape(B * S, width), g, b).astype(cd)

    features = []
    for i, blk in enumerate(params["blocks"]):
        g1, b1 = blk["ln1"]
        qkv = mm(xcur, blk["in_proj_w"], blk["in_proj_b"], ln=(g1, b1))
        o = attn(qkv.reshape(B, S, 3 * width), scale)
        xcur = mm(o.reshape(B * S, width), blk["out_proj_w"],
                  blk["out_proj_b"], residual=xcur)
        g2, b2 = blk["ln2"]
        h = mm(xcur, blk["fc_w"], blk["fc_b"], act="quick_gelu", ln=(g2, b2))
        xcur = mm(h, blk["proj_w"], blk["proj_b"], residual=xcur)
        if len(out_indices) > 1 and i in out_indices:
            feat = xcur.reshape(B, S, width)[:, 1:, :].transpose(0, 2, 1)
            features.append(feat.reshape(B, width, Hp, Wp).astype(jnp.float32))

    gp, bp = params["ln_post"]
    x3 = mm(xcur, params["proj"], ln=(gp, bp), out_dtype=jnp.float32)
    out_dim = params["proj"].shape[1]
    x3 = x3.reshape(B, S, out_dim)
    global_embedding = x3[:, 0]
    global_embedding = global_embedding / jnp.linalg.norm(
        global_embedding, axis=1, keepdims=True)
    return tuple(features), global_embedding


# ------------------------------------ main ------------------------------------

if __name__ == "__main__":
    # Small synthetic config consistent with the module's constructor:
    #   input_resolution=32, patch_size=8 -> 4x4=16 patches, seq=17
    #   width=64, layers=4, heads=4, output_dim=32, out_indices=[1, 3]
    B = 2
    input_resolution = 32
    patch_size = 8
    width = 64
    layers = 4
    heads = 4
    output_dim = 32
    out_indices = (1, 3)
    spatial = input_resolution // patch_size
    num_patches = spatial * spatial

    key = jax.random.PRNGKey(0)
    kx, kp = jax.random.split(key)
    x = jax.random.normal(kx, (B, 3, input_resolution, input_resolution), jnp.float32)
    params = init_params(kp, width=width, layers=layers, patch_size=patch_size,
                         num_patches=num_patches, output_dim=output_dim)

    fwd = jax.jit(functools.partial(
        clip_vit_forward, patch_size=patch_size, width=width, heads=heads,
        out_indices=out_indices, get_embeddings=True))

    outs = fwd(params, x)
    jax.block_until_ready(jax.tree_util.tree_leaves(outs))

    feats, global_emb = outs
    assert len(feats) == len(out_indices)
    assert feats[0].shape == (B, width, spatial, spatial)
    assert global_emb.shape == (B, output_dim)
    assert bool(jnp.all(jnp.isfinite(global_emb)))

    # Numerical check against a pure-JAX reference that mirrors the bf16 casts.
    ref_feats, ref_global = _ref_forward(
        params, x, patch_size=patch_size, width=width, heads=heads,
        out_indices=out_indices, get_embeddings=True)

    def _close(a, b):
        a = jnp.asarray(a, jnp.float32)
        b = jnp.asarray(b, jnp.float32)
        tol = 0.08 * float(jnp.max(jnp.abs(b))) + 0.02
        return float(jnp.max(jnp.abs(a - b))) < tol

    assert _close(global_emb, ref_global), "global embedding mismatch"
    for fa, fb in zip(feats, ref_feats):
        assert _close(fa, fb), "feature map mismatch"

    print("KERNEL_OK")
</pallas_src>

<mosaic_0001>
module attributes {stable_mosaic.version = 11 : i64} {
  func.func @_linear_single_k_kernel(%arg0: i32, %arg1: i32, %arg2: memref<32x192xbf16, #tpu.memory_space<vmem>>, %arg3: memref<192x64xbf16, #tpu.memory_space<vmem>>, %arg4: memref<32x64xbf16, #tpu.memory_space<vmem>>) attributes {dimension_semantics = [#tpu.dimension_semantics<parallel>, #tpu.dimension_semantics<parallel>], iteration_bounds = array<i64: 1, 1>, scalar_prefetch = 0 : i64, scratch_operands = 0 : i64, tpu.core_type = #tpu.core_type<tc>, window_params = [{transform_indices = @transform_0, window_bounds = array<i64: 32, 192>}, {transform_indices = @transform_1, window_bounds = array<i64: 192, 64>}, {transform_indices = @transform_2, window_bounds = array<i64: 32, 64>}]} {
    %c0 = arith.constant 0 : index
    %c0_0 = arith.constant 0 : index
    %0 = vector.load %arg2[%c0, %c0_0] : memref<32x192xbf16, #tpu.memory_space<vmem>>, vector<32x192xbf16>
    %c0_1 = arith.constant 0 : index
    %c0_2 = arith.constant 0 : index
    %1 = vector.load %arg3[%c0_1, %c0_2] : memref<192x64xbf16, #tpu.memory_space<vmem>>, vector<192x64xbf16>
    %cst = arith.constant dense<0.000000e+00> : vector<32x64xf32>
    %2 = tpu.matmul %0, %1, %cst {dimension_numbers = #tpu.dot_dimension_numbers<[1], [0], [0], [1], [0, 0, 1, 1], [], []>} : vector<32x192xbf16>, vector<192x64xbf16>, vector<32x64xf32> -> vector<32x64xf32>
    %3 = arith.truncf %2 : vector<32x64xf32> to vector<32x64xbf16>
    %c0_3 = arith.constant 0 : index
    %c0_4 = arith.constant 0 : index
    %4 = vector.load %arg4[%c0_3, %c0_4] : memref<32x64xbf16, #tpu.memory_space<vmem>>, vector<32x64xbf16>
    tpu.vector_store %arg4[%c0_3, %c0_4], %3 {strides = array<i32>} : memref<32x64xbf16, #tpu.memory_space<vmem>>, vector<32x64xbf16>,
    return
  }
  func.func @transform_0(%arg0: i32, %arg1: i32) -> (i32, i32) {
    %c0_i32 = arith.constant 0 : i32
    %c0_i32_0 = arith.constant 0 : i32
    return %arg0, %c0_i32 : i32, i32
  }
  func.func @transform_1(%arg0: i32, %arg1: i32) -> (i32, i32) {
    %c0_i32 = arith.constant 0 : i32
    %c0_i32_0 = arith.constant 0 : i32
    return %c0_i32, %arg1 : i32, i32
  }
  func.func @transform_2(%arg0: i32, %arg1: i32) -> (i32, i32) {
    %c0_i32 = arith.constant 0 : i32
    return %arg0, %arg1 : i32, i32
  }
}

module attributes {stable_mosaic.version = 11 : i64} {
  func.func @_linear_single_k_kernel(%arg0: i32, %arg1: i32, %arg2: memref<34x64xbf16, #tpu.memory_space<vmem>>, %arg3: memref<1x64xf32, #tpu.memory_space<vmem>>, %arg4: memref<1x64xf32, #tpu.memory_space<vmem>>, %arg5: memref<64x192xbf16, #tpu.memory_space<vmem>>, %arg6: memref<1x192xf32, #tpu.memory_space<vmem>>, %arg7: memref<34x192xbf16, #tpu.memory_space<vmem>>) attributes {dimension_semantics = [#tpu.dimension_semantics<parallel>, #tpu.dimension_semantics<parallel>], iteration_bounds = array<i64: 1, 1>, scalar_prefetch = 0 : i64, scratch_operands = 0 : i64, tpu.core_type = #tpu.core_type<tc>, window_params = [{transform_indices = @transform_0, window_bounds = array<i64: 34, 64>}, {pipeline_mode = #tpu.pipeline_mode<synchronous>, transform_indices = @transform_1, window_bounds = array<i64: 1, 64>}, {pipeline_mode = #tpu.pipeline_mode<synchronous>, transform_indices = @transform_2, window_bounds = array<i64: 1, 64>}, {transform_indices = @transform_3, window_bounds = array<i64: 64, 192>}, {transform_indices = @transform_4, window_bounds = array<i64: 1, 192>}, {transform_indices = @transform_5, window_bounds = array<i64: 34, 192>}]} {
    %c0 = arith.constant 0 : index
    %c0_0 = arith.constant 0 : index
    %0 = vector.load %arg2[%c0, %c0_0] : memref<34x64xbf16, #tpu.memory_space<vmem>>, vector<34x64xbf16>
    %1 = arith.extf %0 : vector<34x64xbf16> to vector<34x64xf32>
    %cst = arith.constant dense<0.000000e+00> : vector<34xf32>
    %2 = vector.multi_reduction <add>, %1, %cst [1] : vector<34x64xf32> to vector<34xf32>
    %3 = vector.shape_cast %2 : vector<34xf32> to vector<34x1xf32>
    %cst_1 = arith.constant 6.400000e+01 : f32
    %4 = vector.broadcast %cst_1 : f32 to vector<34x1xf32>
    %5 = arith.divf %3, %4 : vector<34x1xf32>
    %6 = vector.broadcast %5 : vector<34x1xf32> to vector<34x64xf32>
    %7 = arith.subf %1, %6 : vector<34x64xf32>
    %8 = arith.mulf %7, %7 : vector<34x64xf32>
    %cst_2 = arith.constant dense<0.000000e+00> : vector<34xf32>
    %9 = vector.multi_reduction <add>, %8, %cst_2 [1] : vector<34x64xf32> to vector<34xf32>
    %10 = vector.shape_cast %9 : vector<34xf32> to vector<34x1xf32>
    %cst_3 = arith.constant 6.400000e+01 : f32
    %11 = vector.broadcast %cst_3 : f32 to vector<34x1xf32>
    %12 = arith.divf %10, %11 : vector<34x1xf32>
    %cst_4 = arith.constant 9.99999974E-6 : f32
    %13 = vector.broadcast %cst_4 : f32 to vector<34x1xf32>
    %14 = arith.addf %12, %13 : vector<34x1xf32>
    %15 = math.rsqrt %14 : vector<34x1xf32>
    %16 = vector.broadcast %15 : vector<34x1xf32> to vector<34x64xf32>
    %17 = arith.mulf %7, %16 : vector<34x64xf32>
    %c0_5 = arith.constant 0 : index
    %c0_6 = arith.constant 0 : index
    %18 = vector.load %arg3[%c0_5, %c0_6] : memref<1x64xf32, #tpu.memory_space<vmem>>, vector<1x64xf32>
    %19 = vector.broadcast %18 : vector<1x64xf32> to vector<34x64xf32>
    %20 = arith.mulf %17, %19 : vector<34x64xf32>
    %c0_7 = arith.constant 0 : index
    %c0_8 = arith.constant 0 : index
    %21 = vector.load %arg4[%c0_7, %c0_8] : memref<1x64xf32, #tpu.memory_space<vmem>>, vector<1x64xf32>
    %22 = vector.broadcast %21 : vector<1x64xf32> to vector<34x64xf32>
    %23 = arith.addf %20, %22 : vector<34x64xf32>
    %24 = arith.truncf %23 : vector<34x64xf32> to vector<34x64xbf16>
    %c0_9 = arith.constant 0 : index
    %c0_10 = arith.constant 0 : index
    %25 = vector.load %arg5[%c0_9, %c0_10] : memref<64x192xbf16, #tpu.memory_space<vmem>>, vector<64x192xbf16>
    %cst_11 = arith.constant dense<0.000000e+00> : vector<34x192xf32>
    %26 = tpu.matmul %24, %25, %cst_11 {dimension_numbers = #tpu.dot_dimension_numbers<[1], [0], [0], [1], [0, 0, 1, 1], [], []>} : vector<34x64xbf16>, vector<64x192xbf16>, vector<34x192xf32> -> vector<34x192xf32>
    %c0_12 = arith.constant 0 : index
    %c0_13 = arith.constant 0 : index
    %27 = vector.load %arg6[%c0_12, %c0_13] : memref<1x192xf32, #tpu.memory_space<vmem>>, vector<1x192xf32>
    %28 = vector.broadcast %27 : vector<1x192xf32> to vector<34x192xf32>
    %29 = arith.addf %26, %28 : vector<34x192xf32>
    %30 = arith.truncf %29 : vector<34x192xf32> to vector<34x192xbf16>
    %c0_14 = arith.constant 0 : index
    %c0_15 = arith.constant 0 : index
    %31 = vector.load %arg7[%c0_14, %c0_15] : memref<34x192xbf16, #tpu.memory_space<vmem>>, vector<34x192xbf16>
    tpu.vector_store %arg7[%c0_14, %c0_15], %30 {strides = array<i32>} : memref<34x192xbf16, #tpu.memory_space<vmem>>, vector<34x192xbf16>,
    return
  }
  func.func @transform_0(%arg0: i32, %arg1: i32) -> (i32, i32) {
    %c0_i32 = arith.constant 0 : i32
    %c0_i32_0 = arith.constant 0 : i32
    return %arg0, %c0_i32 : i32, i32
  }
  func.func @transform_1(%arg0: i32, %arg1: i32) -> (i32, i32) {
    %c0_i32 = arith.constant 0 : i32
    %c0_i32_0 = arith.constant 0 : i32
    %c0_i32_1 = arith.constant 0 : i32
    return %c0_i32, %c0_i32_0 : i32, i32
  }
  func.func @transform_2(%arg0: i32, %arg1: i32) -> (i32, i32) {
    %c0_i32 = arith.constant 0 : i32
    %c0_i32_0 = arith.constant 0 : i32
    %c0_i32_1 = arith.constant 0 : i32
    return %c0_i32, %c0_i32_0 : i32, i32
  }
  func.func @transform_3(%arg0: i32, %arg1: i32) -> (i32, i32) {
    %c0_i32 = arith.constant 0 : i32
    %c0_i32_0 = arith.constant 0 : i32
    return %c0_i32, %arg1 : i32, i32
  }
  func.func @transform_4(%arg0: i32, %arg1: i32) -> (i32, i32) {
    %c0_i32 = arith.constant 0 : i32
    %c0_i32_0 = arith.constant 0 : i32
    return %c0_i32, %arg1 : i32, i32
  }
  func.func @transform_5(%arg0: i32, %arg1: i32) -> (i32, i32) {
    %c0_i32 = arith.constant 0 : i32
    return %arg0, %arg1 : i32, i32
  }
}

module attributes {stable_mosaic.version = 11 : i64} {
  func.func @_attn_kernel(%arg0: i32, %arg1: memref<1x17x192xbf16, #tpu.memory_space<vmem>>, %arg2: memref<1x17x64xbf16, #tpu.memory_space<vmem>>) attributes {dimension_semantics = [#tpu.dimension_semantics<parallel>], iteration_bounds = array<i64: 2>, scalar_prefetch = 0 : i64, scratch_operands = 0 : i64, tpu.core_type = #tpu.core_type<tc>, window_params = [{transform_indices = @transform_0, window_bounds = array<i64: 1, 17, 192>}, {transform_indices = @transform_1, window_bounds = array<i64: 1, 17, 64>}]} {
    %c0 = arith.constant 0 : index
    %c0_0 = arith.constant 0 : index
    %c0_1 = arith.constant 0 : index
    %0 = vector.load %arg1[%c0, %c0_0, %c0_1] : memref<1x17x192xbf16, #tpu.memory_space<vmem>>, vector<1x17x192xbf16>
    %1 = vector.shape_cast %0 : vector<1x17x192xbf16> to vector<17x192xbf16>
    %2 = vector.extract_strided_slice %1 {offsets = [0, 0], sizes = [17, 16], strides = [1, 1]} : vector<17x192xbf16> to vector<17x16xbf16>
    %3 = vector.extract_strided_slice %1 {offsets = [0, 64], sizes = [17, 16], strides = [1, 1]} : vector<17x192xbf16> to vector<17x16xbf16>
    %4 = vector.extract_strided_slice %1 {offsets = [0, 128], sizes = [17, 16], strides = [1, 1]} : vector<17x192xbf16> to vector<17x16xbf16>
    %5 = tpu.transpose %3, [1, 0] : vector<17x16xbf16> -> vector<16x17xbf16>
    %cst = arith.constant dense<0.000000e+00> : vector<17x17xf32>
    %6 = tpu.matmul %2, %5, %cst {dimension_numbers = #tpu.dot_dimension_numbers<[1], [0], [0], [1], [0, 0, 1, 1], [], []>} : vector<17x16xbf16>, vector<16x17xbf16>, vector<17x17xf32> -> vector<17x17xf32>
    %cst_2 = arith.constant 2.500000e-01 : f32
    %7 = vector.broadcast %cst_2 : f32 to vector<17x17xf32>
    %8 = arith.mulf %6, %7 : vector<17x17xf32>
    %cst_3 = arith.constant dense<0xFF800000> : vector<17xf32>
    %9 = vector.multi_reduction <maximumf>, %8, %cst_3 [1] : vector<17x17xf32> to vector<17xf32>
    %10 = vector.shape_cast %9 : vector<17xf32> to vector<17x1xf32>
    %11 = vector.broadcast %10 : vector<17x1xf32> to vector<17x17xf32>
    %12 = arith.subf %8, %11 : vector<17x17xf32>
    %13 = math.exp %12 : vector<17x17xf32>
    %cst_4 = arith.constant dense<0.000000e+00> : vector<17xf32>
    %14 = vector.multi_reduction <add>, %13, %cst_4 [1] : vector<17x17xf32> to vector<17xf32>
    %15 = vector.shape_cast %14 : vector<17xf32> to vector<17x1xf32>
    %16 = tpu.reciprocal %15 {approx = true} : vector<17x1xf32> -> vector<17x1xf32>
    %17 = vector.broadcast %16 : vector<17x1xf32> to vector<17x17xf32>
    %18 = arith.mulf %13, %17 : vector<17x17xf32>
    %19 = arith.truncf %18 : vector<17x17xf32> to vector<17x17xbf16>
    %cst_5 = arith.constant dense<0.000000e+00> : vector<17x16xf32>
    %20 = tpu.matmul %19, %4, %cst_5 {dimension_numbers = #tpu.dot_dimension_numbers<[1], [0], [0], [1], [0, 0, 1, 1], [], []>} : vector<17x17xbf16>, vector<17x16xbf16>, vector<17x16xf32> -> vector<17x16xf32>
    %21 = vector.extract_strided_slice %1 {offsets = [0, 16], sizes = [17, 16], strides = [1, 1]} : vector<17x192xbf16> to vector<17x16xbf16>
    %22 = vector.extract_strided_slice %1 {offsets = [0, 80], sizes = [17, 16], strides = [1, 1]} : vector<17x192xbf16> to vector<17x16xbf16>
    %23 = vector.extract_strided_slice %1 {offsets = [0, 144], sizes = [17, 16], strides = [1, 1]} : vector<17x192xbf16> to vector<17x16xbf16>
    %24 = tpu.transpose %22, [1, 0] : vector<17x16xbf16> -> vector<16x17xbf16>
    %cst_6 = arith.constant dense<0.000000e+00> : vector<17x17xf32>
    %25 = tpu.matmul %21, %24, %cst_6 {dimension_numbers = #tpu.dot_dimension_numbers<[1], [0], [0], [1], [0, 0, 1, 1], [], []>} : vector<17x16xbf16>, vector<16x17xbf16>, vector<17x17xf32> -> vector<17x17xf32>
    %cst_7 = arith.constant 2.500000e-01 : f32
    %26 = vector.broadcast %cst_7 : f32 to vector<17x17xf32>
    %27 = arith.mulf %25, %26 : vector<17x17xf32>
    %cst_8 = arith.constant dense<0xFF800000> : vector<17xf32>
    %28 = vector.multi_reduction <maximumf>, %27, %cst_8 [1] : vector<17x17xf32> to vector<17xf32>
    %29 = vector.shape_cast %28 : vector<17xf32> to vector<17x1xf32>
    %30 = vector.broadcast %29 : vector<17x1xf32> to vector<17x17xf32>
    %31 = arith.subf %27, %30 : vector<17x17xf32>
    %32 = math.exp %31 : vector<17x17xf32>
    %cst_9 = arith.constant dense<0.000000e+00> : vector<17xf32>
    %33 = vector.multi_reduction <add>, %32, %cst_9 [1] : vector<17x17xf32> to vector<17xf32>
    %34 = vector.shape_cast %33 : vector<17xf32> to vector<17x1xf32>
    %35 = tpu.reciprocal %34 {approx = true} : vector<17x1xf32> -> vector<17x1xf32>
    %36 = vector.broadcast %35 : vector<17x1xf32> to vector<17x17xf32>
    %37 = arith.mulf %32, %36 : vector<17x17xf32>
    %38 = arith.truncf %37 : vector<17x17xf32> to vector<17x17xbf16>
    %cst_10 = arith.constant dense<0.000000e+00> : vector<17x16xf32>
    %39 = tpu.matmul %38, %23, %cst_10 {dimension_numbers = #tpu.dot_dimension_numbers<[1], [0], [0], [1], [0, 0, 1, 1], [], []>} : vector<17x17xbf16>, vector<17x16xbf16>, vector<17x16xf32> -> vector<17x16xf32>
    %40 = vector.extract_strided_slice %1 {offsets = [0, 32], sizes = [17, 16], strides = [1, 1]} : vector<17x192xbf16> to vector<17x16xbf16>
    %41 = vector.extract_strided_slice %1 {offsets = [0, 96], sizes = [17, 16], strides = [1, 1]} : vector<17x192xbf16> to vector<17x16xbf16>
    %42 = vector.extract_strided_slice %1 {offsets = [0, 160], sizes = [17, 16], strides = [1, 1]} : vector<17x192xbf16> to vector<17x16xbf16>
    %43 = tpu.transpose %41, [1, 0] : vector<17x16xbf16> -> vector<16x17xbf16>
    %cst_11 = arith.constant dense<0.000000e+00> : vector<17x17xf32>
    %44 = tpu.matmul %40, %43, %cst_11 {dimension_numbers = #tpu.dot_dimension_numbers<[1], [0], [0], [1], [0, 0, 1, 1], [], []>} : vector<17x16xbf16>, vector<16x17xbf16>, vector<17x17xf32> -> vector<17x17xf32>
    %cst_12 = arith.constant 2.500000e-01 : f32
    %45 = vector.broadcast %cst_12 : f32 to vector<17x17xf32>
    %46 = arith.mulf %44, %45 : vector<17x17xf32>
    %cst_13 = arith.constant dense<0xFF800000> : vector<17xf32>
    %47 = vector.multi_reduction <maximumf>, %46, %cst_13 [1] : vector<17x17xf32> to vector<17xf32>
    %48 = vector.shape_cast %47 : vector<17xf32> to vector<17x1xf32>
    %49 = vector.broadcast %48 : vector<17x1xf32> to vector<17x17xf32>
    %50 = arith.subf %46, %49 : vector<17x17xf32>
    %51 = math.exp %50 : vector<17x17xf32>
    %cst_14 = arith.constant dense<0.000000e+00> : vector<17xf32>
    %52 = vector.multi_reduction <add>, %51, %cst_14 [1] : vector<17x17xf32> to vector<17xf32>
    %53 = vector.shape_cast %52 : vector<17xf32> to vector<17x1xf32>
    %54 = tpu.reciprocal %53 {approx = true} : vector<17x1xf32> -> vector<17x1xf32>
    %55 = vector.broadcast %54 : vector<17x1xf32> to vector<17x17xf32>
    %56 = arith.mulf %51, %55 : vector<17x17xf32>
    %57 = arith.truncf %56 : vector<17x17xf32> to vector<17x17xbf16>
    %cst_15 = arith.constant dense<0.000000e+00> : vector<17x16xf32>
    %58 = tpu.matmul %57, %42, %cst_15 {dimension_numbers = #tpu.dot_dimension_numbers<[1], [0], [0], [1], [0, 0, 1, 1], [], []>} : vector<17x17xbf16>, vector<17x16xbf16>, vector<17x16xf32> -> vector<17x16xf32>
    %59 = vector.extract_strided_slice %1 {offsets = [0, 48], sizes = [17, 16], strides = [1, 1]} : vector<17x192xbf16> to vector<17x16xbf16>
    %60 = vector.extract_strided_slice %1 {offsets = [0, 112], sizes = [17, 16], strides = [1, 1]} : vector<17x192xbf16> to vector<17x16xbf16>
    %61 = vector.extract_strided_slice %1 {offsets = [0, 176], sizes = [17, 16], strides = [1, 1]} : vector<17x192xbf16> to vector<17x16xbf16>
    %62 = tpu.transpose %60, [1, 0] : vector<17x16xbf16> -> vector<16x17xbf16>
    %cst_16 = arith.constant dense<0.000000e+00> : vector<17x17xf32>
    %63 = tpu.matmul %59, %62, %cst_16 {dimension_numbers = #tpu.dot_dimension_numbers<[1], [0], [0], [1], [0, 0, 1, 1], [], []>} : vector<17x16xbf16>, vector<16x17xbf16>, vector<17x17xf32> -> vector<17x17xf32>
    %cst_17 = arith.constant 2.500000e-01 : f32
    %64 = vector.broadcast %cst_17 : f32 to vector<17x17xf32>
    %65 = arith.mulf %63, %64 : vector<17x17xf32>
    %cst_18 = arith.constant dense<0xFF800000> : vector<17xf32>
    %66 = vector.multi_reduction <maximumf>, %65, %cst_18 [1] : vector<17x17xf32> to vector<17xf32>
    %67 = vector.shape_cast %66 : vector<17xf32> to vector<17x1xf32>
    %68 = vector.broadcast %67 : vector<17x1xf32> to vector<17x17xf32>
    %69 = arith.subf %65, %68 : vector<17x17xf32>
    %70 = math.exp %69 : vector<17x17xf32>
    %cst_19 = arith.constant dense<0.000000e+00> : vector<17xf32>
    %71 = vector.multi_reduction <add>, %70, %cst_19 [1] : vector<17x17xf32> to vector<17xf32>
    %72 = vector.shape_cast %71 : vector<17xf32> to vector<17x1xf32>
    %73 = tpu.reciprocal %72 {approx = true} : vector<17x1xf32> -> vector<17x1xf32>
    %74 = vector.broadcast %73 : vector<17x1xf32> to vector<17x17xf32>
    %75 = arith.mulf %70, %74 : vector<17x17xf32>
    %76 = arith.truncf %75 : vector<17x17xf32> to vector<17x17xbf16>
    %cst_20 = arith.constant dense<0.000000e+00> : vector<17x16xf32>
    %77 = tpu.matmul %76, %61, %cst_20 {dimension_numbers = #tpu.dot_dimension_numbers<[1], [0], [0], [1], [0, 0, 1, 1], [], []>} : vector<17x17xbf16>, vector<17x16xbf16>, vector<17x16xf32> -> vector<17x16xf32>
    %78 = tpu.concatenate %20, %39, %58, %77 in 1 : vector<17x16xf32>, vector<17x16xf32>, vector<17x16xf32>, vector<17x16xf32> -> vector<17x64xf32>
    %79 = arith.truncf %78 : vector<17x64xf32> to vector<17x64xbf16>
    %c0_21 = arith.constant 0 : index
    %c0_22 = arith.constant 0 : index
    %c0_23 = arith.constant 0 : index
    %80 = vector.load %arg2[%c0_21, %c0_22, %c0_23] : memref<1x17x64xbf16, #tpu.memory_space<vmem>>, vector<1x17x64xbf16>
    %81 = vector.shape_cast %80 : vector<1x17x64xbf16> to vector<17x64xbf16>
    %82 = vector.shape_cast %79 : vector<17x64xbf16> to vector<1x17x64xbf16>
    tpu.vector_store %arg2[%c0_21, %c0_22, %c0_23], %82 {strides = array<i32>} : memref<1x17x64xbf16, #tpu.memory_space<vmem>>, vector<1x17x64xbf16>,
    return
  }
  func.func @transform_0(%arg0: i32) -> (i32, i32, i32) {
    %c0_i32 = arith.constant 0 : i32
    %c0_i32_0 = arith.constant 0 : i32
    %c0_i32_1 = arith.constant 0 : i32
    return %arg0, %c0_i32, %c0_i32_0 : i32, i32, i32
  }
  func.func @transform_1(%arg0: i32) -> (i32, i32, i32) {
    %c0_i32 = arith.constant 0 : i32
    %c0_i32_0 = arith.constant 0 : i32
    %c0_i32_1 = arith.constant 0 : i32
    return %arg0, %c0_i32, %c0_i32_0 : i32, i32, i32
  }
}

module attributes {stable_mosaic.version = 11 : i64} {
  func.func @_ln_kernel(%arg0: i32, %arg1: memref<34x64xf32, #tpu.memory_space<vmem>>, %arg2: memref<1x64xf32, #tpu.memory_space<vmem>>, %arg3: memref<1x64xf32, #tpu.memory_space<vmem>>, %arg4: memref<34x64xbf16, #tpu.memory_space<vmem>>) attributes {dimension_semantics = [#tpu.dimension_semantics<parallel>], iteration_bounds = array<i64: 1>, scalar_prefetch = 0 : i64, scratch_operands = 0 : i64, tpu.core_type = #tpu.core_type<tc>, window_params = [{transform_indices = @transform_0, window_bounds = array<i64: 34, 64>}, {pipeline_mode = #tpu.pipeline_mode<synchronous>, transform_indices = @transform_1, window_bounds = array<i64: 1, 64>}, {pipeline_mode = #tpu.pipeline_mode<synchronous>, transform_indices = @transform_2, window_bounds = array<i64: 1, 64>}, {transform_indices = @transform_3, window_bounds = array<i64: 34, 64>}]} {
    %c0 = arith.constant 0 : index
    %c0_0 = arith.constant 0 : index
    %0 = vector.load %arg1[%c0, %c0_0] : memref<34x64xf32, #tpu.memory_space<vmem>>, vector<34x64xf32>
    %cst = arith.constant dense<0.000000e+00> : vector<34xf32>
    %1 = vector.multi_reduction <add>, %0, %cst [1] : vector<34x64xf32> to vector<34xf32>
    %2 = vector.shape_cast %1 : vector<34xf32> to vector<34x1xf32>
    %cst_1 = arith.constant 6.400000e+01 : f32
    %3 = vector.broadcast %cst_1 : f32 to vector<34x1xf32>
    %4 = arith.divf %2, %3 : vector<34x1xf32>
    %5 = vector.broadcast %4 : vector<34x1xf32> to vector<34x64xf32>
    %6 = arith.subf %0, %5 : vector<34x64xf32>
    %7 = arith.mulf %6, %6 : vector<34x64xf32>
    %cst_2 = arith.constant dense<0.000000e+00> : vector<34xf32>
    %8 = vector.multi_reduction <add>, %7, %cst_2 [1] : vector<34x64xf32> to vector<34xf32>
    %9 = vector.shape_cast %8 : vector<34xf32> to vector<34x1xf32>
    %cst_3 = arith.constant 6.400000e+01 : f32
    %10 = vector.broadcast %cst_3 : f32 to vector<34x1xf32>
    %11 = arith.divf %9, %10 : vector<34x1xf32>
    %cst_4 = arith.constant 9.99999974E-6 : f32
    %12 = vector.broadcast %cst_4 : f32 to vector<34x1xf32>
    %13 = arith.addf %11, %12 : vector<34x1xf32>
    %14 = math.rsqrt %13 : vector<34x1xf32>
    %15 = vector.broadcast %14 : vector<34x1xf32> to vector<34x64xf32>
    %16 = arith.mulf %6, %15 : vector<34x64xf32>
    %c0_5 = arith.constant 0 : index
    %c0_6 = arith.constant 0 : index
    %17 = vector.load %arg2[%c0_5, %c0_6] : memref<1x64xf32, #tpu.memory_space<vmem>>, vector<1x64xf32>
    %18 = vector.broadcast %17 : vector<1x64xf32> to vector<34x64xf32>
    %19 = arith.mulf %16, %18 : vector<34x64xf32>
    %c0_7 = arith.constant 0 : index
    %c0_8 = arith.constant 0 : index
    %20 = vector.load %arg3[%c0_7, %c0_8] : memref<1x64xf32, #tpu.memory_space<vmem>>, vector<1x64xf32>
    %21 = vector.broadcast %20 : vector<1x64xf32> to vector<34x64xf32>
    %22 = arith.addf %19, %21 : vector<34x64xf32>
    %23 = arith.truncf %22 : vector<34x64xf32> to vector<34x64xbf16>
    %c0_9 = arith.constant 0 : index
    %c0_10 = arith.constant 0 : index
    %24 = vector.load %arg4[%c0_9, %c0_10] : memref<34x64xbf16, #tpu.memory_space<vmem>>, vector<34x64xbf16>
    tpu.vector_store %arg4[%c0_9, %c0_10], %23 {strides = array<i32>} : memref<34x64xbf16, #tpu.memory_space<vmem>>, vector<34x64xbf16>,
    return
  }
  func.func @transform_0(%arg0: i32) -> (i32, i32) {
    %c0_i32 = arith.constant 0 : i32
    %c0_i32_0 = arith.constant 0 : i32
    return %arg0, %c0_i32 : i32, i32
  }
  func.func @transform_1(%arg0: i32) -> (i32, i32) {
    %c0_i32 = arith.constant 0 : i32
    %c0_i32_0 = arith.constant 0 : i32
    %c0_i32_1 = arith.constant 0 : i32
    return %c0_i32, %c0_i32_0 : i32, i32
  }
  func.func @transform_2(%arg0: i32) -> (i32, i32) {
    %c0_i32 = arith.constant 0 : i32
    %c0_i32_0 = arith.constant 0 : i32
    %c0_i32_1 = arith.constant 0 : i32
    return %c0_i32, %c0_i32_0 : i32, i32
  }
  func.func @transform_3(%arg0: i32) -> (i32, i32) {
    %c0_i32 = arith.constant 0 : i32
    %c0_i32_0 = arith.constant 0 : i32
    return %arg0, %c0_i32 : i32, i32
  }
}

module attributes {stable_mosaic.version = 11 : i64} {
  func.func @_linear_single_k_kernel(%arg0: i32, %arg1: i32, %arg2: memref<34x64xbf16, #tpu.memory_space<vmem>>, %arg3: memref<64x64xbf16, #tpu.memory_space<vmem>>, %arg4: memref<1x64xf32, #tpu.memory_space<vmem>>, %arg5: memref<34x64xbf16, #tpu.memory_space<vmem>>, %arg6: memref<34x64xbf16, #tpu.memory_space<vmem>>) attributes {dimension_semantics = [#tpu.dimension_semantics<parallel>, #tpu.dimension_semantics<parallel>], iteration_bounds = array<i64: 1, 1>, scalar_prefetch = 0 : i64, scratch_operands = 0 : i64, tpu.core_type = #tpu.core_type<tc>, window_params = [{transform_indices = @transform_0, window_bounds = array<i64: 34, 64>}, {transform_indices = @transform_1, window_bounds = array<i64: 64, 64>}, {transform_indices = @transform_2, window_bounds = array<i64: 1, 64>}, {transform_indices = @transform_3, window_bounds = array<i64: 34, 64>}, {transform_indices = @transform_4, window_bounds = array<i64: 34, 64>}]} {
    %c0 = arith.constant 0 : index
    %c0_0 = arith.constant 0 : index
    %0 = vector.load %arg2[%c0, %c0_0] : memref<34x64xbf16, #tpu.memory_space<vmem>>, vector<34x64xbf16>
    %c0_1 = arith.constant 0 : index
    %c0_2 = arith.constant 0 : index
    %1 = vector.load %arg3[%c0_1, %c0_2] : memref<64x64xbf16, #tpu.memory_space<vmem>>, vector<64x64xbf16>
    %cst = arith.constant dense<0.000000e+00> : vector<34x64xf32>
    %2 = tpu.matmul %0, %1, %cst {dimension_numbers = #tpu.dot_dimension_numbers<[1], [0], [0], [1], [0, 0, 1, 1], [], []>} : vector<34x64xbf16>, vector<64x64xbf16>, vector<34x64xf32> -> vector<34x64xf32>
    %c0_3 = arith.constant 0 : index
    %c0_4 = arith.constant 0 : index
    %3 = vector.load %arg4[%c0_3, %c0_4] : memref<1x64xf32, #tpu.memory_space<vmem>>, vector<1x64xf32>
    %4 = vector.broadcast %3 : vector<1x64xf32> to vector<34x64xf32>
    %5 = arith.addf %2, %4 : vector<34x64xf32>
    %c0_5 = arith.constant 0 : index
    %c0_6 = arith.constant 0 : index
    %6 = vector.load %arg5[%c0_5, %c0_6] : memref<34x64xbf16, #tpu.memory_space<vmem>>, vector<34x64xbf16>
    %7 = arith.extf %6 : vector<34x64xbf16> to vector<34x64xf32>
    %8 = arith.addf %5, %7 : vector<34x64xf32>
    %9 = arith.truncf %8 : vector<34x64xf32> to vector<34x64xbf16>
    %c0_7 = arith.constant 0 : index
    %c0_8 = arith.constant 0 : index
    %10 = vector.load %arg6[%c0_7, %c0_8] : memref<34x64xbf16, #tpu.memory_space<vmem>>, vector<34x64xbf16>
    tpu.vector_store %arg6[%c0_7, %c0_8], %9 {strides = array<i32>} : memref<34x64xbf16, #tpu.memory_space<vmem>>, vector<34x64xbf16>,
    return
  }
  func.func @transform_0(%arg0: i32, %arg1: i32) -> (i32, i32) {
    %c0_i32 = arith.constant 0 : i32
    %c0_i32_0 = arith.constant 0 : i32
    return %arg0, %c0_i32 : i32, i32
  }
  func.func @transform_1(%arg0: i32, %arg1: i32) -> (i32, i32) {
    %c0_i32 = arith.constant 0 : i32
    %c0_i32_0 = arith.constant 0 : i32
    return %c0_i32, %arg1 : i32, i32
  }
  func.func @transform_2(%arg0: i32, %arg1: i32) -> (i32, i32) {
    %c0_i32 = arith.constant 0 : i32
    %c0_i32_0 = arith.constant 0 : i32
    return %c0_i32, %arg1 : i32, i32
  }
  func.func @transform_3(%arg0: i32, %arg1: i32) -> (i32, i32) {
    %c0_i32 = arith.constant 0 : i32
    return %arg0, %arg1 : i32, i32
  }
  func.func @transform_4(%arg0: i32, %arg1: i32) -> (i32, i32) {
    %c0_i32 = arith.constant 0 : i32
    return %arg0, %arg1 : i32, i32
  }
}

module attributes {stable_mosaic.version = 11 : i64} {
  func.func @_linear_single_k_kernel(%arg0: i32, %arg1: i32, %arg2: memref<34x64xbf16, #tpu.memory_space<vmem>>, %arg3: memref<1x64xf32, #tpu.memory_space<vmem>>, %arg4: memref<1x64xf32, #tpu.memory_space<vmem>>, %arg5: memref<64x256xbf16, #tpu.memory_space<vmem>>, %arg6: memref<1x256xf32, #tpu.memory_space<vmem>>, %arg7: memref<34x256xbf16, #tpu.memory_space<vmem>>) attributes {dimension_semantics = [#tpu.dimension_semantics<parallel>, #tpu.dimension_semantics<parallel>], iteration_bounds = array<i64: 1, 1>, scalar_prefetch = 0 : i64, scratch_operands = 0 : i64, tpu.core_type = #tpu.core_type<tc>, window_params = [{transform_indices = @transform_0, window_bounds = array<i64: 34, 64>}, {pipeline_mode = #tpu.pipeline_mode<synchronous>, transform_indices = @transform_1, window_bounds = array<i64: 1, 64>}, {pipeline_mode = #tpu.pipeline_mode<synchronous>, transform_indices = @transform_2, window_bounds = array<i64: 1, 64>}, {transform_indices = @transform_3, window_bounds = array<i64: 64, 256>}, {transform_indices = @transform_4, window_bounds = array<i64: 1, 256>}, {transform_indices = @transform_5, window_bounds = array<i64: 34, 256>}]} {
    %c0 = arith.constant 0 : index
    %c0_0 = arith.constant 0 : index
    %0 = vector.load %arg2[%c0, %c0_0] : memref<34x64xbf16, #tpu.memory_space<vmem>>, vector<34x64xbf16>
    %1 = arith.extf %0 : vector<34x64xbf16> to vector<34x64xf32>
    %cst = arith.constant dense<0.000000e+00> : vector<34xf32>
    %2 = vector.multi_reduction <add>, %1, %cst [1] : vector<34x64xf32> to vector<34xf32>
    %3 = vector.shape_cast %2 : vector<34xf32> to vector<34x1xf32>
    %cst_1 = arith.constant 6.400000e+01 : f32
    %4 = vector.broadcast %cst_1 : f32 to vector<34x1xf32>
    %5 = arith.divf %3, %4 : vector<34x1xf32>
    %6 = vector.broadcast %5 : vector<34x1xf32> to vector<34x64xf32>
    %7 = arith.subf %1, %6 : vector<34x64xf32>
    %8 = arith.mulf %7, %7 : vector<34x64xf32>
    %cst_2 = arith.constant dense<0.000000e+00> : vector<34xf32>
    %9 = vector.multi_reduction <add>, %8, %cst_2 [1] : vector<34x64xf32> to vector<34xf32>
    %10 = vector.shape_cast %9 : vector<34xf32> to vector<34x1xf32>
    %cst_3 = arith.constant 6.400000e+01 : f32
    %11 = vector.broadcast %cst_3 : f32 to vector<34x1xf32>
    %12 = arith.divf %10, %11 : vector<34x1xf32>
    %cst_4 = arith.constant 9.99999974E-6 : f32
    %13 = vector.broadcast %cst_4 : f32 to vector<34x1xf32>
    %14 = arith.addf %12, %13 : vector<34x1xf32>
    %15 = math.rsqrt %14 : vector<34x1xf32>
    %16 = vector.broadcast %15 : vector<34x1xf32> to vector<34x64xf32>
    %17 = arith.mulf %7, %16 : vector<34x64xf32>
    %c0_5 = arith.constant 0 : index
    %c0_6 = arith.constant 0 : index
    %18 = vector.load %arg3[%c0_5, %c0_6] : memref<1x64xf32, #tpu.memory_space<vmem>>, vector<1x64xf32>
    %19 = vector.broadcast %18 : vector<1x64xf32> to vector<34x64xf32>
    %20 = arith.mulf %17, %19 : vector<34x64xf32>
    %c0_7 = arith.constant 0 : index
    %c0_8 = arith.constant 0 : index
    %21 = vector.load %arg4[%c0_7, %c0_8] : memref<1x64xf32, #tpu.memory_space<vmem>>, vector<1x64xf32>
    %22 = vector.broadcast %21 : vector<1x64xf32> to vector<34x64xf32>
    %23 = arith.addf %20, %22 : vector<34x64xf32>
    %24 = arith.truncf %23 : vector<34x64xf32> to vector<34x64xbf16>
    %c0_9 = arith.constant 0 : index
    %c0_10 = arith.constant 0 : index
    %25 = vector.load %arg5[%c0_9, %c0_10] : memref<64x256xbf16, #tpu.memory_space<vmem>>, vector<64x256xbf16>
    %cst_11 = arith.constant dense<0.000000e+00> : vector<34x256xf32>
    %26 = tpu.matmul %24, %25, %cst_11 {dimension_numbers = #tpu.dot_dimension_numbers<[1], [0], [0], [1], [0, 0, 1, 1], [], []>} : vector<34x64xbf16>, vector<64x256xbf16>, vector<34x256xf32> -> vector<34x256xf32>
    %c0_12 = arith.constant 0 : index
    %c0_13 = arith.constant 0 : index
    %27 = vector.load %arg6[%c0_12, %c0_13] : memref<1x256xf32, #tpu.memory_space<vmem>>, vector<1x256xf32>
    %28 = vector.broadcast %27 : vector<1x256xf32> to vector<34x256xf32>
    %29 = arith.addf %26, %28 : vector<34x256xf32>
    %cst_14 = arith.constant 1.702000e+00 : f32
    %30 = vector.broadcast %cst_14 : f32 to vector<34x256xf32>
    %31 = arith.mulf %30, %29 : vector<34x256xf32>
    %32 = arith.negf %31 : vector<34x256xf32>
    %33 = math.exp %32 : vector<34x256xf32>
    %cst_15 = arith.constant 1.000000e+00 : f32
    %34 = vector.broadcast %cst_15 : f32 to vector<34x256xf32>
    %35 = arith.addf %34, %33 : vector<34x256xf32>
    %36 = arith.divf %34, %35 : vector<34x256xf32>
    %37 = arith.mulf %29, %36 : vector<34x256xf32>
    %38 = arith.truncf %37 : vector<34x256xf32> to vector<34x256xbf16>
    %c0_16 = arith.constant 0 : index
    %c0_17 = arith.constant 0 : index
    %39 = vector.load %arg7[%c0_16, %c0_17] : memref<34x256xbf16, #tpu.memory_space<vmem>>, vector<34x256xbf16>
    tpu.vector_store %arg7[%c0_16, %c0_17], %38 {strides = array<i32>} : memref<34x256xbf16, #tpu.memory_space<vmem>>, vector<34x256xbf16>,
    return
  }
  func.func @transform_0(%arg0: i32, %arg1: i32) -> (i32, i32) {
    %c0_i32 = arith.constant 0 : i32
    %c0_i32_0 = arith.constant 0 : i32
    return %arg0, %c0_i32 : i32, i32
  }
  func.func @transform_1(%arg0: i32, %arg1: i32) -> (i32, i32) {
    %c0_i32 = arith.constant 0 : i32
    %c0_i32_0 = arith.constant 0 : i32
    %c0_i32_1 = arith.constant 0 : i32
    return %c0_i32, %c0_i32_0 : i32, i32
  }
  func.func @transform_2(%arg0: i32, %arg1: i32) -> (i32, i32) {
    %c0_i32 = arith.constant 0 : i32
    %c0_i32_0 = arith.constant 0 : i32
    %c0_i32_1 = arith.constant 0 : i32
    return %c0_i32, %c0_i32_0 : i32, i32
  }
  func.func @transform_3(%arg0: i32, %arg1: i32) -> (i32, i32) {
    %c0_i32 = arith.constant 0 : i32
    %c0_i32_0 = arith.constant 0 : i32
    return %c0_i32, %arg1 : i32, i32
  }
  func.func @transform_4(%arg0: i32, %arg1: i32) -> (i32, i32) {
    %c0_i32 = arith.constant 0 : i32
    %c0_i32_0 = arith.constant 0 : i32
    return %c0_i32, %arg1 : i32, i32
  }
  func.func @transform_5(%arg0: i32, %arg1: i32) -> (i32, i32) {
    %c0_i32 = arith.constant 0 : i32
    return %arg0, %arg1 : i32, i32
  }
}

module attributes {stable_mosaic.version = 11 : i64} {
  func.func @_linear_single_k_kernel(%arg0: i32, %arg1: i32, %arg2: memref<34x256xbf16, #tpu.memory_space<vmem>>, %arg3: memref<256x64xbf16, #tpu.memory_space<vmem>>, %arg4: memref<1x64xf32, #tpu.memory_space<vmem>>, %arg5: memref<34x64xbf16, #tpu.memory_space<vmem>>, %arg6: memref<34x64xbf16, #tpu.memory_space<vmem>>) attributes {dimension_semantics = [#tpu.dimension_semantics<parallel>, #tpu.dimension_semantics<parallel>], iteration_bounds = array<i64: 1, 1>, scalar_prefetch = 0 : i64, scratch_operands = 0 : i64, tpu.core_type = #tpu.core_type<tc>, window_params = [{transform_indices = @transform_0, window_bounds = array<i64: 34, 256>}, {transform_indices = @transform_1, window_bounds = array<i64: 256, 64>}, {transform_indices = @transform_2, window_bounds = array<i64: 1, 64>}, {transform_indices = @transform_3, window_bounds = array<i64: 34, 64>}, {transform_indices = @transform_4, window_bounds = array<i64: 34, 64>}]} {
    %c0 = arith.constant 0 : index
    %c0_0 = arith.constant 0 : index
    %0 = vector.load %arg2[%c0, %c0_0] : memref<34x256xbf16, #tpu.memory_space<vmem>>, vector<34x256xbf16>
    %c0_1 = arith.constant 0 : index
    %c0_2 = arith.constant 0 : index
    %1 = vector.load %arg3[%c0_1, %c0_2] : memref<256x64xbf16, #tpu.memory_space<vmem>>, vector<256x64xbf16>
    %cst = arith.constant dense<0.000000e+00> : vector<34x64xf32>
    %2 = tpu.matmul %0, %1, %cst {dimension_numbers = #tpu.dot_dimension_numbers<[1], [0], [0], [1], [0, 0, 1, 1], [], []>} : vector<34x256xbf16>, vector<256x64xbf16>, vector<34x64xf32> -> vector<34x64xf32>
    %c0_3 = arith.constant 0 : index
    %c0_4 = arith.constant 0 : index
    %3 = vector.load %arg4[%c0_3, %c0_4] : memref<1x64xf32, #tpu.memory_space<vmem>>, vector<1x64xf32>
    %4 = vector.broadcast %3 : vector<1x64xf32> to vector<34x64xf32>
    %5 = arith.addf %2, %4 : vector<34x64xf32>
    %c0_5 = arith.constant 0 : index
    %c0_6 = arith.constant 0 : index
    %6 = vector.load %arg5[%c0_5, %c0_6] : memref<34x64xbf16, #tpu.memory_space<vmem>>, vector<34x64xbf16>
    %7 = arith.extf %6 : vector<34x64xbf16> to vector<34x64xf32>
    %8 = arith.addf %5, %7 : vector<34x64xf32>
    %9 = arith.truncf %8 : vector<34x64xf32> to vector<34x64xbf16>
    %c0_7 = arith.constant 0 : index
    %c0_8 = arith.constant 0 : index
    %10 = vector.load %arg6[%c0_7, %c0_8] : memref<34x64xbf16, #tpu.memory_space<vmem>>, vector<34x64xbf16>
    tpu.vector_store %arg6[%c0_7, %c0_8], %9 {strides = array<i32>} : memref<34x64xbf16, #tpu.memory_space<vmem>>, vector<34x64xbf16>,
    return
  }
  func.func @transform_0(%arg0: i32, %arg1: i32) -> (i32, i32) {
    %c0_i32 = arith.constant 0 : i32
    %c0_i32_0 = arith.constant 0 : i32
    return %arg0, %c0_i32 : i32, i32
  }
  func.func @transform_1(%arg0: i32, %arg1: i32) -> (i32, i32) {
    %c0_i32 = arith.constant 0 : i32
    %c0_i32_0 = arith.constant 0 : i32
    return %c0_i32, %arg1 : i32, i32
  }
  func.func @transform_2(%arg0: i32, %arg1: i32) -> (i32, i32) {
    %c0_i32 = arith.constant 0 : i32
    %c0_i32_0 = arith.constant 0 : i32
    return %c0_i32, %arg1 : i32, i32
  }
  func.func @transform_3(%arg0: i32, %arg1: i32) -> (i32, i32) {
    %c0_i32 = arith.constant 0 : i32
    return %arg0, %arg1 : i32, i32
  }
  func.func @transform_4(%arg0: i32, %arg1: i32) -> (i32, i32) {
    %c0_i32 = arith.constant 0 : i32
    return %arg0, %arg1 : i32, i32
  }
}

module attributes {stable_mosaic.version = 11 : i64} {
  func.func @_linear_single_k_kernel(%arg0: i32, %arg1: i32, %arg2: memref<34x64xbf16, #tpu.memory_space<vmem>>, %arg3: memref<1x64xf32, #tpu.memory_space<vmem>>, %arg4: memref<1x64xf32, #tpu.memory_space<vmem>>, %arg5: memref<64x32xbf16, #tpu.memory_space<vmem>>, %arg6: memref<34x32xf32, #tpu.memory_space<vmem>>) attributes {dimension_semantics = [#tpu.dimension_semantics<parallel>, #tpu.dimension_semantics<parallel>], iteration_bounds = array<i64: 1, 1>, scalar_prefetch = 0 : i64, scratch_operands = 0 : i64, tpu.core_type = #tpu.core_type<tc>, window_params = [{transform_indices = @transform_0, window_bounds = array<i64: 34, 64>}, {pipeline_mode = #tpu.pipeline_mode<synchronous>, transform_indices = @transform_1, window_bounds = array<i64: 1, 64>}, {pipeline_mode = #tpu.pipeline_mode<synchronous>, transform_indices = @transform_2, window_bounds = array<i64: 1, 64>}, {transform_indices = @transform_3, window_bounds = array<i64: 64, 32>}, {transform_indices = @transform_4, window_bounds = array<i64: 34, 32>}]} {
    %c0 = arith.constant 0 : index
    %c0_0 = arith.constant 0 : index
    %0 = vector.load %arg2[%c0, %c0_0] : memref<34x64xbf16, #tpu.memory_space<vmem>>, vector<34x64xbf16>
    %1 = arith.extf %0 : vector<34x64xbf16> to vector<34x64xf32>
    %cst = arith.constant dense<0.000000e+00> : vector<34xf32>
    %2 = vector.multi_reduction <add>, %1, %cst [1] : vector<34x64xf32> to vector<34xf32>
    %3 = vector.shape_cast %2 : vector<34xf32> to vector<34x1xf32>
    %cst_1 = arith.constant 6.400000e+01 : f32
    %4 = vector.broadcast %cst_1 : f32 to vector<34x1xf32>
    %5 = arith.divf %3, %4 : vector<34x1xf32>
    %6 = vector.broadcast %5 : vector<34x1xf32> to vector<34x64xf32>
    %7 = arith.subf %1, %6 : vector<34x64xf32>
    %8 = arith.mulf %7, %7 : vector<34x64xf32>
    %cst_2 = arith.constant dense<0.000000e+00> : vector<34xf32>
    %9 = vector.multi_reduction <add>, %8, %cst_2 [1] : vector<34x64xf32> to vector<34xf32>
    %10 = vector.shape_cast %9 : vector<34xf32> to vector<34x1xf32>
    %cst_3 = arith.constant 6.400000e+01 : f32
    %11 = vector.broadcast %cst_3 : f32 to vector<34x1xf32>
    %12 = arith.divf %10, %11 : vector<34x1xf32>
    %cst_4 = arith.constant 9.99999974E-6 : f32
    %13 = vector.broadcast %cst_4 : f32 to vector<34x1xf32>
    %14 = arith.addf %12, %13 : vector<34x1xf32>
    %15 = math.rsqrt %14 : vector<34x1xf32>
    %16 = vector.broadcast %15 : vector<34x1xf32> to vector<34x64xf32>
    %17 = arith.mulf %7, %16 : vector<34x64xf32>
    %c0_5 = arith.constant 0 : index
    %c0_6 = arith.constant 0 : index
    %18 = vector.load %arg3[%c0_5, %c0_6] : memref<1x64xf32, #tpu.memory_space<vmem>>, vector<1x64xf32>
    %19 = vector.broadcast %18 : vector<1x64xf32> to vector<34x64xf32>
    %20 = arith.mulf %17, %19 : vector<34x64xf32>
    %c0_7 = arith.constant 0 : index
    %c0_8 = arith.constant 0 : index
    %21 = vector.load %arg4[%c0_7, %c0_8] : memref<1x64xf32, #tpu.memory_space<vmem>>, vector<1x64xf32>
    %22 = vector.broadcast %21 : vector<1x64xf32> to vector<34x64xf32>
    %23 = arith.addf %20, %22 : vector<34x64xf32>
    %24 = arith.truncf %23 : vector<34x64xf32> to vector<34x64xbf16>
    %c0_9 = arith.constant 0 : index
    %c0_10 = arith.constant 0 : index
    %25 = vector.load %arg5[%c0_9, %c0_10] : memref<64x32xbf16, #tpu.memory_space<vmem>>, vector<64x32xbf16>
    %cst_11 = arith.constant dense<0.000000e+00> : vector<34x32xf32>
    %26 = tpu.matmul %24, %25, %cst_11 {dimension_numbers = #tpu.dot_dimension_numbers<[1], [0], [0], [1], [0, 0, 1, 1], [], []>} : vector<34x64xbf16>, vector<64x32xbf16>, vector<34x32xf32> -> vector<34x32xf32>
    %c0_12 = arith.constant 0 : index
    %c0_13 = arith.constant 0 : index
    %27 = vector.load %arg6[%c0_12, %c0_13] : memref<34x32xf32, #tpu.memory_space<vmem>>, vector<34x32xf32>
    tpu.vector_store %arg6[%c0_12, %c0_13], %26 {strides = array<i32>} : memref<34x32xf32, #tpu.memory_space<vmem>>, vector<34x32xf32>,
    return
  }
  func.func @transform_0(%arg0: i32, %arg1: i32) -> (i32, i32) {
    %c0_i32 = arith.constant 0 : i32
    %c0_i32_0 = arith.constant 0 : i32
    return %arg0, %c0_i32 : i32, i32
  }
  func.func @transform_1(%arg0: i32, %arg1: i32) -> (i32, i32) {
    %c0_i32 = arith.constant 0 : i32
    %c0_i32_0 = arith.constant 0 : i32
    %c0_i32_1 = arith.constant 0 : i32
    return %c0_i32, %c0_i32_0 : i32, i32
  }
  func.func @transform_2(%arg0: i32, %arg1: i32) -> (i32, i32) {
    %c0_i32 = arith.constant 0 : i32
    %c0_i32_0 = arith.constant 0 : i32
    %c0_i32_1 = arith.constant 0 : i32
    return %c0_i32, %c0_i32_0 : i32, i32
  }
  func.func @transform_3(%arg0: i32, %arg1: i32) -> (i32, i32) {
    %c0_i32 = arith.constant 0 : i32
    %c0_i32_0 = arith.constant 0 : i32
    return %c0_i32, %arg1 : i32, i32
  }
  func.func @transform_4(%arg0: i32, %arg1: i32) -> (i32, i32) {
    %c0_i32 = arith.constant 0 : i32
    return %arg0, %arg1 : i32, i32
  }
}

</mosaic_0001>

<bundles_post_ra>
// kernel: clip_vit_forward.23
= control target key start
LH: loop header
LB: loop body
LE: loop exit
PB: predicated region body
PF: predicated region fallthrough
CT: control target
= control target key end

     0   :  { %v280_v0 = vmov 0   ;;  %vm130_vm0 = vcmask 523264   ;;  %vm202_vm1 = vcmask 519168   ;;  %s380_s1 = inlined_call_operand.vmem [shape: bf16[192,64], index: 1, kind: input, shape index: {}]   ;;  %s381_s0 = inlined_call_operand.vmem [shape: bf16[32,192], index: 0, kind: input, shape index: {}]   ;;  %s382_s2 = inlined_call_operand.vmem [shape: bf16[32,64], index: 2, kind: output, shape index: {}]  }
   0x1   :  { %137 = vmatprep.subr.bf16.mxu0 %v280_v0  ;;  %237 = vmatprep.subr.bf16.mxu1 %v280_v0  ;;  %v262_v1 = vld [vmem:[%s380_s1 + $0x38] sm:$0xff]   ;;  %v263_v2 = vld [vmem:[%s380_s1 + $0x30] sm:$0xff]   ;;  %v264_v3 = vld [vmem:[%s380_s1 + $0x28] sm:$0xff]  }
   0x2   :  { %138 = vmatpush1.bf16.msra.mxu0 %v262_v1  ;;  %249 = vmatpush1.bf16.msra.mxu1 %v262_v1  ;;  %v265_v4 = vld [vmem:[%s380_s1 + $0x20] sm:$0xff]   ;;  %v266_v6 = vld [vmem:[%s380_s1 + $0x18] sm:$0xff]   ;;  %v267_v8 = vld [vmem:[%s380_s1 + $0x10] sm:$0xff]  }
   0x3   :  { %139 = vmatprep.subr.bf16.mxu0 %v280_v0  ;;  %238 = vmatprep.subr.bf16.mxu1 %v280_v0  ;;  %v276_v5 = vld [vmem:[%s381_s0 + $0x4] ss:$8 sps:$4 sm:$0xff]   ;;  %v279_v7 = vld [vmem:[%s381_s0 + $0x14] ss:$8 sps:$4 sm:$0xff]   ;;  %v274_v15 = vld [vmem:[%s381_s0] ss:$8 sps:$4 sm:$0xff]  }
   0x4   :  { %227 = vmatprep.mubr.msk.bf16.mxu0 %vm130_vm0, %v276_v5  ;;  %228 = vmatprep.mubr.msk.bf16.mxu1 %vm130_vm0, %v279_v7  ;;  %v268_v9 = vld [vmem:[%s380_s1 + $0x8] sm:$0xff]   ;;  %v269_v10 = vld [vmem:[%s380_s1] sm:$0xff]   ;;  %v270_v11 = vld [vmem:[%s380_s1 + $0x58] sm:$0xff]  }
   0x5   :  { %v271_v12 = vld [vmem:[%s380_s1 + $0x50] sm:$0xff]   ;;  %v272_v13 = vld [vmem:[%s380_s1 + $0x48] sm:$0xff]   ;;  %v273_v14 = vld [vmem:[%s380_s1 + $0x40] sm:$0xff]  }
   0x6   :  { %140 = vmatpush1.bf16.msra.mxu0 %v263_v2  ;;  %250 = vmatpush1.bf16.msra.mxu1 %v263_v2  ;;  %v277_v16 = vld [vmem:[%s381_s0 + $0x10] ss:$8 sps:$4 sm:$0xff]  }
   0x7   :  { %141 = vmatprep.subr.bf16.mxu0 %v280_v0  ;;  %239 = vmatprep.subr.bf16.mxu1 %v280_v0 }
   0xa   :  { %142 = vmatpush1.bf16.msra.mxu0 %v264_v3  ;;  %251 = vmatpush1.bf16.msra.mxu1 %v264_v3 }
   0xb   :  { %143 = vmatprep.subr.bf16.mxu0 %v280_v0  ;;  %240 = vmatprep.subr.bf16.mxu1 %v280_v0 }
   0xe   :  { %144 = vmatpush1.bf16.msra.mxu0 %v265_v4  ;;  %252 = vmatpush1.bf16.msra.mxu1 %v265_v4 }
   0xf   :  { %145 = vmatprep.subr.bf16.mxu0 %v280_v0  ;;  %241 = vmatprep.subr.bf16.mxu1 %v280_v0 }
  0x12   :  { %146 = vmatpush1.bf16.msra.mxu0 %v266_v6  ;;  %253 = vmatpush1.bf16.msra.mxu1 %v266_v6 }
  0x13   :  { %147 = vmatprep.subr.bf16.mxu0 %v280_v0  ;;  %242 = vmatprep.subr.bf16.mxu1 %v280_v0 }
  0x16   :  { %148 = vmatpush1.bf16.msra.mxu0 %v267_v8  ;;  %254 = vmatpush1.bf16.msra.mxu1 %v267_v8 }
  0x17   :  { %149 = vmatprep.subr.bf16.mxu0 %v280_v0  ;;  %243 = vmatprep.subr.bf16.mxu1 %v280_v0 }
  0x1a   :  { %150 = vmatpush1.bf16.msra.mxu0 %v268_v9  ;;  %255 = vmatpush1.bf16.msra.mxu1 %v268_v9 }
  0x1b   :  { %151 = vmatprep.subr.bf16.mxu0 %v280_v0  ;;  %244 = vmatprep.subr.bf16.mxu1 %v280_v0 }
  0x1e   :  { %152 = vmatpush1.bf16.msra.mxu0 %v269_v10  ;;  %256 = vmatpush1.bf16.msra.mxu1 %v269_v10 }
  0x1f   :  { %161 = vmatprep.subr.bf16.mxu0 %v280_v0  ;;  %245 = vmatprep.subr.bf16.mxu1 %v280_v0 }
  0x22   :  { %162 = vmatpush2.bf16.msra.mxu0 %v270_v11  ;;  %257 = vmatpush2.bf16.msra.mxu1 %v270_v11 }
  0x23   :  { %163 = vmatprep.subr.bf16.mxu0 %v280_v0  ;;  %246 = vmatprep.subr.bf16.mxu1 %v280_v0 }
  0x26   :  { %164 = vmatpush2.bf16.msra.mxu0 %v271_v12  ;;  %258 = vmatpush2.bf16.msra.mxu1 %v271_v12 }
  0x27   :  { %165 = vmatprep.subr.bf16.mxu0 %v280_v0  ;;  %247 = vmatprep.subr.bf16.mxu1 %v280_v0 }
  0x2a   :  { %166 = vmatpush2.bf16.msra.mxu0 %v272_v13  ;;  %259 = vmatpush2.bf16.msra.mxu1 %v272_v13 }
  0x2b   :  { %167 = vmatprep.subr.bf16.mxu0 %v280_v0  ;;  %248 = vmatprep.subr.bf16.mxu1 %v280_v0 }
  0x2e   :  { %168 = vmatpush2.bf16.msra.mxu0 %v273_v14  ;;  %260 = vmatpush2.bf16.msra.mxu1 %v273_v14 }
  0x31   :  { %170 = vmatmul.mubr.bf16.vlgmr.msra.gmra.mxu0 %v274_v15  ;;  %178 = vmatmul.mubr.bf16.vlgmr.msra.gmra.mxu1 %v277_v16 }
  0xf1   :  { %v171_v17 = vpop.f32.mrf.mxu0  ;;  %v179_v18 = vpop.f32.mrf.mxu1 }
  0xf2   :  { %v233_v19 = vpack.c.bf16 %v171_v17, %v171_v17  ;;  %v235_v20 = vpack.c.bf16 %v179_v18, %v179_v18 }
  0xf3   :  { %v173_v21 = vpop.f32.mrf.mxu0  ;;  %v181_v22 = vpop.f32.mrf.mxu1 }
  0xf4   :  { %203 = vst.msk [vmem:[%s382_s2] sm:$0xf] %vm202_vm1, %v233_v19  ;;  %205 = vst.msk [vmem:[%s382_s2 + $0x8] sm:$0xf] %vm202_vm1, %v235_v20 }
  0xf5   :  { %v174_v23 = vpop.f32.mrf.mxu0  ;;  %v182_v24 = vpop.f32.mrf.mxu1 }
  0xf6   :  { %v234_v25 = vpack.c.bf16 %v174_v23, %v174_v23  ;;  %v236_v26 = vpack.c.bf16 %v182_v24, %v182_v24 }
  0xf7   :  { %v176_v27 = vpop.f32.mrf.mxu0  ;;  %v184_v28 = vpop.f32.mrf.mxu1 }
  0xf8   :  { %204 = vst.msk [vmem:[%s382_s2 + $0x4] sm:$0xf] %vm202_vm1, %v234_v25  ;;  %206 = vst.msk [vmem:[%s382_s2 + $0xc] sm:$0xf] %vm202_vm1, %v236_v26 }

// kernel: clip_vit_forward.25
= control target key start
LH: loop header
LB: loop body
LE: loop exit
PB: predicated region body
PF: predicated region fallthrough
CT: control target
= control target key end

     0   :  { %vm31_vm0 = vcmask 523264   ;;  %vm44_vm1 = vcmask 517120   ;;  %v366_v40 = vmov 0   ;;  %vm288_vm2 = vcmask 1043456   ;;  %s507_s0 = inlined_call_operand.vmem [shape: bf16[34,64], index: 0, kind: input, shape index: {}]   ;;  %s508_s3 = inlined_call_operand.vmem [shape: bf16[64,192], index: 3, kind: input, shape index: {}]   ;;  %s509_s1 = inlined_call_operand.vmem [shape: f32[1,64], index: 1, kind: input, shape index: {}]   ;;  %s510_s2 = inlined_call_operand.vmem [shape: f32[1,64], index: 2, kind: input, shape index: {}]   ;;  %s511_s4 = inlined_call_operand.vmem [shape: f32[1,192], index: 4, kind: input, shape index: {}]   ;;  %s512_s5 = inlined_call_operand.vmem [shape: bf16[34,192], index: 5, kind: output, shape index: {}]  }
   0x1   :  { %v334_v0 = vld [vmem:[%s507_s0 + $0x8] sm:$0xff]   ;;  %v327_v1 = vld [vmem:[%s507_s0] sm:$0xff]   ;;  %v25_v5 = vld [vmem:[%s507_s0 + $0x10] sm:$0x1]  ;;  %237 = vmatprep.mubr.bf16.mxu1 %v366_v40  ;;  %227 = vmatprep.mubr.bf16.mxu0 %v366_v40  ;;  %vm289_vm3 = vcmask 523268   ;;  %vm295_vm5 = vcmask 1040384  }
   0x2   :  { %v332_v2 = vunpack.c.l.bf16 %v334_v0  ;;  %v333_v3 = vunpack.c.h.bf16 %v334_v0  ;;  %v328_v4 = vunpack.c.l.bf16 %v327_v1  ;;  %v329_v6 = vunpack.c.h.bf16 %v327_v1  ;;  %v344_v38 = vld [vmem:[%s508_s3 + $0x34] ss:$8 sps:$4 sm:$0xff]   ;;  %v346_v39 = vld [vmem:[%s508_s3 + $0x30] ss:$8 sps:$4 sm:$0xff]   ;;  %v347_v41 = vld [vmem:[%s508_s3 + $0x24] ss:$8 sps:$4 sm:$0xff]  }
   0x3   :  { %v30_v10 = vunpack.c.l.bf16 %v25_v5  ;;  %335 = vmatprep.subr.bf16.mxu1 %v344_v38  ;;  %203 = vmatprep.subr.bf16.mxu0 %v344_v38  ;;  %v349_v42 = vld [vmem:[%s508_s3 + $0x20] ss:$8 sps:$4 sm:$0xff]   ;;  %v350_v43 = vld [vmem:[%s508_s3 + $0x14] ss:$8 sps:$4 sm:$0xff]   ;;  %v352_v44 = vld [vmem:[%s508_s3 + $0x10] ss:$8 sps:$4 sm:$0xff]  }
   0x4   :  { %v38_v7 = vsel %vm31_vm0, %v332_v2, 0.0  ;;  %v32_v8 = vsel %vm31_vm0, %v328_v4, 0.0  ;;  %v41_v9 = vsel %vm31_vm0, %v333_v3, 0.0  ;;  %v35_v11 = vsel %vm31_vm0, %v329_v6, 0.0  ;;  %339 = vmatpush1.bf16.msra.mxu1 %v346_v39  ;;  %204 = vmatpush1.bf16.msra.mxu0 %v346_v39  ;;  %v353_v45 = vld [vmem:[%s508_s3 + $0x4] ss:$8 sps:$4 sm:$0xff]   ;;  %vm480_vm4 = vmor %vm289_vm3, %vm288_vm2 }
   0x5   :  { %39 = vadd.xlane.f32.xlu0 %v38_v7  ;;  %33 = vadd.xlane.f32.xlu1 %v32_v8  ;;  %v45_v12 = vsel %vm44_vm1, %v30_v10, 0.0  ;;  %v355_v46 = vld [vmem:[%s508_s3] ss:$8 sps:$4 sm:$0xff]   ;;  %vm296_vm6 = vcmask 520196  }
   0x6   :  { %336 = vmatprep.subr.bf16.mxu1 %v347_v41  ;;  %205 = vmatprep.subr.bf16.mxu0 %v347_v41  ;;  %v303_v0 = vld [vmem:[%s509_s1] ss:$0 sm:$0xff]  ;;  %vm297_vm7 = vmor %vm296_vm6, %vm295_vm5 }
   0x7   :  { %v304_v5 = vld [vmem:[%s510_s2] ss:$0 sm:$0xff] }
   0x8   :  { %340 = vmatpush1.bf16.msra.mxu1 %v349_v42  ;;  %206 = vmatpush1.bf16.msra.mxu0 %v349_v42 }
   0x9   :  { %42 = vadd.xlane.f32.xlu0 %v41_v9  ;;  %36 = vadd.xlane.f32.xlu1 %v35_v11 }
   0xa   :  { %337 = vmatprep.subr.bf16.mxu1 %v350_v43  ;;  %207 = vmatprep.subr.bf16.mxu0 %v350_v43 }
   0xc   :  { %341 = vmatpush1.bf16.msra.mxu1 %v352_v44  ;;  %208 = vmatpush1.bf16.msra.mxu0 %v352_v44 }
   0xd   :  { %46 = vadd.xlane.f32.xlu0 %v45_v12  ;;  %338 = vmatprep.subr.bf16.mxu1 %v353_v45 }
   0xe   :  { %209 = vmatprep.subr.bf16.mxu0 %v353_v45 }
  0x10   :  { %342 = vmatpush1.bf16.msra.mxu1 %v355_v46  ;;  %210 = vmatpush1.bf16.msra.mxu0 %v355_v46 }
  0x8e   :  { %v40_v13 = vpop.xlane.xlu0 %39  ;;  %v34_v14 = vpop.xlane.xlu1 %33 }
  0x8f   :  { %v51_v15 = vmul.f32 0.015625, %v40_v13  ;;  %v49_v16 = vmul.f32 0.015625, %v34_v14 }
  0x91   :  { %v411_v17 = vsub.f32 %v332_v2, %v51_v15  ;;  %v413_v18 = vsub.f32 %v328_v4, %v49_v16 }
  0x92   :  { %v43_v19 = vpop.xlane.xlu0 %42  ;;  %v37_v20 = vpop.xlane.xlu1 %36 }
  0x93   :  { %v52_v21 = vmul.f32 0.015625, %v43_v19  ;;  %v61_v22 = vmul.f32 %v411_v17, %v411_v17  ;;  %v50_v23 = vmul.f32 0.015625, %v37_v20  ;;  %v59_v24 = vmul.f32 %v413_v18, %v413_v18 }
  0x95   :  { %v419_v25 = vsub.f32 %v333_v3, %v52_v21  ;;  %v70_v26 = vsel %vm31_vm0, %v61_v22, 0.0  ;;  %v422_v27 = vsub.f32 %v329_v6, %v50_v23  ;;  %v64_v31 = vsel %vm31_vm0, %v59_v24, 0.0 }
  0x96   :  { %v47_v28 = vpop.xlane.xlu0 %46  ;;  %71 = vadd.xlane.f32.xlu1 %v70_v26  ;;  %v136_v23 = vlaneseq }
  0x97   :  { %v53_v29 = vmul.f32 0.015625, %v47_v28  ;;  %v62_v30 = vmul.f32 %v419_v25, %v419_v25  ;;  %v60_v32 = vmul.f32 %v422_v27, %v422_v27 }
  0x98   :  { %v137_v24 = vshrl.u32 %v136_v23, 7 }
  0x99   :  { %v429_v33 = vsub.f32 %v30_v10, %v53_v29  ;;  %v73_v34 = vsel %vm31_vm0, %v62_v30, 0.0  ;;  %v67_v36 = vsel %vm31_vm0, %v60_v32, 0.0 }
  0x9a   :  { %74 = vadd.xlane.f32.xlu0 %v73_v34  ;;  %65 = vadd.xlane.f32.xlu1 %v64_v31  ;;  %v142_v26 = vsub.s32 1, %v137_v24 }
  0x9b   :  { %v63_v35 = vmul.f32 %v429_v33, %v429_v33 }
  0x9d   :  { %v76_v37 = vsel %vm44_vm1, %v63_v35, 0.0 }
  0x9e   :  { %77 = vadd.xlane.f32.xlu1 %v76_v37  ;;  %68 = vadd.xlane.f32.xlu0 %v67_v36 }
 0x11f   :  { %v72_v47 = vpop.xlane.xlu1 %71 }
 0x120   :  { %v81_v48 = vmul.f32 0.015625, %v72_v47 }
 0x122   :  { %v86_v49 = vadd.f32 1e-05, %v81_v48 }
 0x123   :  { %v75_v50 = vpop.xlane.xlu0 %74  ;;  %v66_v51 = vpop.xlane.xlu1 %65 }
 0x124   :  { %356 = vrsqrt.f32 %v86_v49  ;;  %v82_v52 = vmul.f32 0.015625, %v75_v50  ;;  %v79_v53 = vmul.f32 0.015625, %v66_v51 }
 0x126   :  { %v87_v54 = vadd.f32 1e-05, %v82_v52  ;;  %v84_v55 = vadd.f32 1e-05, %v79_v53 }
 0x127   :  { %v69_v56 = vpop.xlane.xlu0 %68  ;;  %v78_v57 = vpop.xlane.xlu1 %77 }
 0x128   :  { %358 = vrsqrt.f32 %v87_v54  ;;  %v80_v58 = vmul.f32 0.015625, %v69_v56  ;;  %v83_v59 = vmul.f32 0.015625, %v78_v57 }
 0x129   :  { %360 = vrsqrt.f32 %v84_v55 }
 0x12a   :  { %v85_v60 = vadd.f32 1e-05, %v80_v58  ;;  %v88_v61 = vadd.f32 1e-05, %v83_v59 }
 0x12c   :  { %362 = vrsqrt.f32 %v85_v60 }
 0x12d   :  { %364 = vrsqrt.f32 %v88_v61 }
 0x131   :  { %v357_v62 = vpop.eup %356 }
 0x132   :  { %v96_v63 = vmul.f32 %v357_v62, %v411_v17 }
 0x134   :  { %v108_v4 = vmul.f32 %v303_v0, %v96_v63 }
 0x135   :  { %v359_v1 = vpop.eup %358 }
 0x136   :  { %v361_v2 = vpop.eup %360  ;;  %v97_v3 = vmul.f32 %v359_v1, %v419_v25  ;;  %v120_v10 = vadd.f32 %v304_v5, %v108_v4  ;;  %v138_v25 = vsub.s32 0, %v137_v24 }
 0x137   :  { %v94_v6 = vmul.f32 %v361_v2, %v413_v18 }
 0x138   :  { %v109_v7 = vmul.f32 %v303_v0, %v97_v3 }
 0x139   :  { %v363_v8 = vpop.eup %362  ;;  %v106_v13 = vmul.f32 %v303_v0, %v94_v6 }
 0x13a   :  { %v365_v9 = vpop.eup %364  ;;  %v121_v11 = vadd.f32 %v304_v5, %v109_v7  ;;  %v95_v12 = vmul.f32 %v363_v8, %v422_v27  ;;  %v134_v27 = vld [vmem:[%s511_s4] sm:$0x3] }
 0x13b   :  { %v98_v14 = vmul.f32 %v365_v9, %v429_v33  ;;  %v118_v19 = vadd.f32 %v304_v5, %v106_v13  ;;  %v139_v28 = vrot.slane %v134_v27, %v138_v25  ;;  %v143_v29 = vrot.slane %v134_v27, %v142_v26 }
 0x13c   :  { %v124_v15 = vpack.c.bf16 %v121_v11, %v120_v10  ;;  %v107_v16 = vmul.f32 %v303_v0, %v95_v12 }
 0x13d   :  { %v110_v17 = vmul.f32 %v303_v0, %v98_v14 }
 0x13e   :  { %314 = vmatmul.mubr.msk.bf16.vlgmr.msra.gmra.mxu1 %vm31_vm0, %v124_v15  ;;  %v119_v20 = vadd.f32 %v304_v5, %v107_v16 }
 0x13f   :  { %247 = vmatprep.mubr.bf16.mxu1 %v366_v40  ;;  %v122_v21 = vadd.f32 %v304_v5, %v110_v17 }
 0x140   :  { %v123_v18 = vpack.c.bf16 %v119_v20, %v118_v19 }
 0x141   :  { %v125_v22 = vpack.c.bf16 %v122_v21, %v122_v21 }
 0x142   :  { %313 = vmatmul.mubr.msk.bf16.vlgmr.msra.gmra.mxu0 %vm31_vm0, %v123_v18 }
 0x146   :  { %315 = vmatmul.mubr.msk.bf16.gmra.mxu1 %vm31_vm0, %v125_v22 }
 0x1fe   :  { %v239_v30 = vpop.f32.mrf.mxu1 }
 0x1ff   :  { %v240_v32 = vadd.f32 %v239_v30, %v139_v28 }
 0x200   :  { %v241_v31 = vpop.f32.mrf.mxu1 }
 0x201   :  { %v242_v33 = vadd.f32 %v241_v31, %v143_v29 }
 0x202   :  { %v229_v35 = vpop.f32.mrf.mxu0  ;;  %v243_v36 = vpop.f32.mrf.mxu1 }
 0x203   :  { %v323_v37 = vpack.c.bf16 %v242_v33, %v240_v32  ;;  %v230_v40 = vadd.f32 %v229_v35, %v139_v28  ;;  %v244_v41 = vadd.f32 %v243_v36, %v139_v28 }
 0x204   :  { %v231_v38 = vpop.f32.mrf.mxu0  ;;  %v245_v39 = vpop.f32.mrf.mxu1 }
 0x205   :  { %293 = vst.msk [vmem:[%s512_s5 + $0x10] sm:$0xff] %vm480_vm4, %v323_v37  ;;  %v232_v42 = vadd.f32 %v231_v38, %v143_v29  ;;  %v246_v43 = vadd.f32 %v245_v39, %v143_v29 }
 0x206   :  { %v233_v44 = vpop.f32.mrf.mxu0  ;;  %v249_v45 = vpop.f32.mrf.mxu1 }
 0x207   :  { %v321_v46 = vpack.c.bf16 %v232_v42, %v230_v40  ;;  %v324_v47 = vpack.c.bf16 %v246_v43, %v244_v41  ;;  %v234_v50 = vadd.f32 %v233_v44, %v139_v28  ;;  %v250_v51 = vadd.f32 %v249_v45, %v139_v28 }
 0x208   :  { %v235_v48 = vpop.f32.mrf.mxu0  ;;  %v251_v49 = vpop.f32.mrf.mxu1 }
 0x209   :  { %291 = vst.msk [vmem:[%s512_s5] sm:$0xff] %vm480_vm4, %v321_v46  ;;  %294 = vst.msk [vmem:[%s512_s5 + $0x18] sm:$0xff] %vm480_vm4, %v324_v47  ;;  %v236_v52 = vadd.f32 %v235_v48, %v143_v29  ;;  %v252_v53 = vadd.f32 %v251_v49, %v143_v29 }
 0x20a   :  { %v253_v54 = vpop.f32.mrf.mxu1 }
 0x20b   :  { %v322_v55 = vpack.c.bf16 %v236_v52, %v234_v50  ;;  %v325_v56 = vpack.c.bf16 %v252_v53, %v250_v51 }
 0x20c   :  { %v254_v57 = vpop.f32.mrf.mxu1 }
 0x20d   :  { %292 = vst.msk [vmem:[%s512_s5 + $0x8] sm:$0xff] %vm480_vm4, %v322_v55 }
 0x20e   :  { %298 = vst.msk [vmem:[%s512_s5 + $0x20] sm:$0x11] %vm297_vm7, %v325_v56 }

// kernel: clip_vit_forward.24
= control target key start
LH: loop header
LB: loop body
LE: loop exit
PB: predicated region body
PF: predicated region fallthrough
CT: control target
= control target key end

     0   :  { %vm19_vm0 = vcmask 523264   ;;  %vm32_vm1 = vcmask 517120   ;;  %vm132_vm2 = vcmask 519168   ;;  %vm137_vm3 = vcmask 516096   ;;  %s235_s0 = inlined_call_operand.vmem [shape: f32[34,64], index: 0, kind: input, shape index: {}]   ;;  %s236_s1 = inlined_call_operand.vmem [shape: f32[1,64], index: 1, kind: input, shape index: {}]   ;;  %s237_s2 = inlined_call_operand.vmem [shape: f32[1,64], index: 2, kind: input, shape index: {}]   ;;  %s238_s3 = inlined_call_operand.vmem [shape: bf16[34,64], index: 3, kind: output, shape index: {}]  }
   0x1   :  { %v14_v0 = vld [vmem:[%s235_s0] sm:$0xff]  ;;  %v16_v1 = vld [vmem:[%s235_s0 + $0x10] sm:$0xff]  ;;  %v15_v2 = vld [vmem:[%s235_s0 + $0x8] sm:$0xff] }
   0x2   :  { %v20_v3 = vsel %vm19_vm0, %v14_v0, 0.0  ;;  %v26_v4 = vsel %vm19_vm0, %v16_v1, 0.0  ;;  %v17_v5 = vld [vmem:[%s235_s0 + $0x18] sm:$0xff]  ;;  %v23_v6 = vsel %vm19_vm0, %v15_v2, 0.0  ;;  %v18_v8 = vld [vmem:[%s235_s0 + $0x20] sm:$0x3] }
   0x3   :  { %21 = vadd.xlane.f32.xlu0 %v20_v3  ;;  %27 = vadd.xlane.f32.xlu1 %v26_v4  ;;  %v29_v7 = vsel %vm19_vm0, %v17_v5, 0.0  ;;  %v33_v9 = vsel %vm32_vm1, %v18_v8, 0.0  ;;  %v143_v51 = vld [vmem:[%s236_s1] ss:$0 sm:$0xff] }
   0x4   :  { %v144_v53 = vld [vmem:[%s237_s2] ss:$0 sm:$0xff] }
   0x7   :  { %24 = vadd.xlane.f32.xlu0 %v23_v6  ;;  %30 = vadd.xlane.f32.xlu1 %v29_v7 }
   0xb   :  { %34 = vadd.xlane.f32.xlu0 %v33_v9 }
  0x8c   :  { %v22_v10 = vpop.xlane.xlu0 %21  ;;  %v28_v11 = vpop.xlane.xlu1 %27 }
  0x8d   :  { %v37_v12 = vmul.f32 0.015625, %v22_v10  ;;  %v39_v13 = vmul.f32 0.015625, %v28_v11 }
  0x8f   :  { %v42_v14 = vsub.f32 %v14_v0, %v37_v12  ;;  %v44_v15 = vsub.f32 %v16_v1, %v39_v13 }
  0x90   :  { %v25_v16 = vpop.xlane.xlu0 %24  ;;  %v31_v17 = vpop.xlane.xlu1 %30 }
  0x91   :  { %v38_v18 = vmul.f32 0.015625, %v25_v16  ;;  %v40_v19 = vmul.f32 0.015625, %v31_v17  ;;  %v47_v20 = vmul.f32 %v42_v14, %v42_v14  ;;  %v49_v21 = vmul.f32 %v44_v15, %v44_v15 }
  0x93   :  { %v43_v22 = vsub.f32 %v15_v2, %v38_v18  ;;  %v45_v23 = vsub.f32 %v17_v5, %v40_v19  ;;  %v52_v24 = vsel %vm19_vm0, %v47_v20, 0.0  ;;  %v58_v27 = vsel %vm19_vm0, %v49_v21, 0.0 }
  0x94   :  { %53 = vadd.xlane.f32.xlu1 %v52_v24  ;;  %v35_v25 = vpop.xlane.xlu0 %34 }
  0x95   :  { %v41_v26 = vmul.f32 0.015625, %v35_v25  ;;  %v48_v28 = vmul.f32 %v43_v22, %v43_v22  ;;  %v50_v29 = vmul.f32 %v45_v23, %v45_v23 }
  0x97   :  { %v46_v30 = vsub.f32 %v18_v8, %v41_v26  ;;  %v55_v31 = vsel %vm19_vm0, %v48_v28, 0.0  ;;  %v61_v32 = vsel %vm19_vm0, %v50_v29, 0.0 }
  0x98   :  { %59 = vadd.xlane.f32.xlu1 %v58_v27  ;;  %56 = vadd.xlane.f32.xlu0 %v55_v31 }
  0x99   :  { %v51_v33 = vmul.f32 %v46_v30, %v46_v30 }
  0x9b   :  { %v64_v34 = vsel %vm32_vm1, %v51_v33, 0.0 }
  0x9c   :  { %62 = vadd.xlane.f32.xlu0 %v61_v32  ;;  %65 = vadd.xlane.f32.xlu1 %v64_v34 }
 0x11d   :  { %v54_v35 = vpop.xlane.xlu1 %53 }
 0x11e   :  { %v67_v36 = vmul.f32 0.015625, %v54_v35 }
 0x120   :  { %v72_v37 = vadd.f32 1e-05, %v67_v36 }
 0x121   :  { %v60_v38 = vpop.xlane.xlu1 %59  ;;  %v57_v39 = vpop.xlane.xlu0 %56 }
 0x122   :  { %155 = vrsqrt.f32 %v72_v37  ;;  %v69_v40 = vmul.f32 0.015625, %v60_v38  ;;  %v68_v41 = vmul.f32 0.015625, %v57_v39 }
 0x124   :  { %v74_v42 = vadd.f32 1e-05, %v69_v40  ;;  %v73_v43 = vadd.f32 1e-05, %v68_v41 }
 0x125   :  { %v66_v44 = vpop.xlane.xlu1 %65  ;;  %v63_v45 = vpop.xlane.xlu0 %62 }
 0x126   :  { %157 = vrsqrt.f32 %v74_v42  ;;  %v71_v46 = vmul.f32 0.015625, %v66_v44  ;;  %v70_v47 = vmul.f32 0.015625, %v63_v45 }
 0x127   :  { %159 = vrsqrt.f32 %v73_v43 }
 0x128   :  { %v76_v48 = vadd.f32 1e-05, %v71_v46  ;;  %v75_v49 = vadd.f32 1e-05, %v70_v47 }
 0x12a   :  { %161 = vrsqrt.f32 %v76_v48 }
 0x12b   :  { %163 = vrsqrt.f32 %v75_v49 }
 0x12f   :  { %v156_v50 = vpop.eup %155 }
 0x130   :  { %v82_v52 = vmul.f32 %v156_v50, %v42_v14 }
 0x132   :  { %v94_v54 = vmul.f32 %v143_v51, %v82_v52 }
 0x133   :  { %v158_v55 = vpop.eup %157 }
 0x134   :  { %v160_v56 = vpop.eup %159  ;;  %v106_v57 = vadd.f32 %v144_v53, %v94_v54  ;;  %v84_v58 = vmul.f32 %v158_v55, %v44_v15 }
 0x135   :  { %v83_v59 = vmul.f32 %v160_v56, %v43_v22 }
 0x136   :  { %v150_v60 = vpack.c.bf16 %v106_v57, %v106_v57  ;;  %v96_v61 = vmul.f32 %v143_v51, %v84_v58 }
 0x137   :  { %v162_v62 = vpop.eup %161  ;;  %v95_v63 = vmul.f32 %v143_v51, %v83_v59 }
 0x138   :  { %v164_v0 = vpop.eup %163  ;;  %133 = vst.msk [vmem:[%s238_s3] sm:$0xf] %vm132_vm2, %v150_v60  ;;  %v108_v1 = vadd.f32 %v144_v53, %v96_v61  ;;  %v86_v2 = vmul.f32 %v162_v62, %v46_v30 }
 0x139   :  { %v107_v3 = vadd.f32 %v144_v53, %v95_v63  ;;  %v85_v4 = vmul.f32 %v164_v0, %v45_v23 }
 0x13a   :  { %v152_v5 = vpack.c.bf16 %v108_v1, %v108_v1  ;;  %v98_v6 = vmul.f32 %v143_v51, %v86_v2 }
 0x13b   :  { %v151_v7 = vpack.c.bf16 %v107_v3, %v107_v3  ;;  %v97_v8 = vmul.f32 %v143_v51, %v85_v4 }
 0x13c   :  { %135 = vst.msk [vmem:[%s238_s3 + $0x8] sm:$0xf] %vm132_vm2, %v152_v5  ;;  %v110_v9 = vadd.f32 %v144_v53, %v98_v6 }
 0x13d   :  { %134 = vst.msk [vmem:[%s238_s3 + $0x4] sm:$0xf] %vm132_vm2, %v151_v7  ;;  %v109_v10 = vadd.f32 %v144_v53, %v97_v8 }
 0x13e   :  { %v154_v11 = vpack.c.bf16 %v110_v9, %v110_v9 }
 0x13f   :  { %v153_v12 = vpack.c.bf16 %v109_v10, %v109_v10 }
 0x140   :  { %138 = vst.msk [vmem:[%s238_s3 + $0x10] sm:$0x1] %vm137_vm3, %v154_v11 }
 0x141   :  { %136 = vst.msk [vmem:[%s238_s3 + $0xc] sm:$0xf] %vm132_vm2, %v153_v12 }

// kernel: clip_vit_forward.26
= control target key start
LH: loop header
LB: loop body
LE: loop exit
PB: predicated region body
PF: predicated region fallthrough
CT: control target
= control target key end

     0   :  { %s1179_s6 = smov 0   ;;  %s1351_s0 = inlined_call_operand.vmem [shape: bf16[2,17,192], index: 0, kind: input, shape index: {}]   ;;  %s1352_s1 = inlined_call_operand.vmem [shape: bf16[2,17,64], index: 1, kind: output, shape index: {}]  }
   0x1 LB: > { %s928_s7 = sadd.s32 4294967295, %s1159_s6   ;;  %p932_p0 = scmp.ge.s32.totalorder %s1159_s6, 1  ;;  %s1159_s6 = sphi %s1179_s6, %s11_s6  }
   0x2   : > { %p87_p1 = scmp.lt.s32.totalorder %s1159_s6, 3 }
   0x4   : > { %p88_p2 = pnand %p932_p0, %p87_p1 }
   0x5   : > { %p107_p3 = scmp.lt.s32.totalorder (!%p88_p2), %s928_s7, 1  ;;  %s1161_s12 = smov (!%p88_p2), 64  }
   0x6   : > { %91 = sbr.rel (%p88_p2) target bundleno = 2591 (0xa1f), region = 24  ;;  %s1162_s13 = smov (!%p88_p2), 112  }
   0x7   : > { %s1164_s14 = smov (!%p88_p2), 48   ;;  %s1165_s15 = smov (!%p88_p2), 32  }
   0x8   : > { %s1166_s16 = smov (!%p88_p2), 96   ;;  %s1167_s17 = smov (!%p88_p2), 16  }
   0x9   : > { %s1168_s18 = smov (!%p88_p2), 80  }
   0xb   : > { %s1354_s7 = smov (!%p107_p3, %s928_s7), 1  ;;  %vm133_vm0 = vcmask 130048   ;;  %vm204_vm1 = vcmask 131072   ;;  %vm197_vm2 = vcmask 138240   ;;  %vm246_vm3 = vcmask 1040384  }
   0xc   : > { %s1067_s8 = smul.u32 24, %s1354_s7  ;;  %v1163_v33 = vmov 0   ;;  %vm843_vm4 = vcmask 261120   ;;  %vm847_vm5 = vcmask 392192   ;;  %vm867_vm6 = vcmask 516096  }
   0xd   : > { %v1221_v34 = vsel %vm246_vm3, 65535, %v1163_v33  ;;  %s1068_s19 = smul.u32 12, %s1354_s7  ;;  %vm868_vm7 = vsmask.f32 256  ;;  %vm864_vm8 = vcmask 519168  }
   0xe   : > { %s1193_s11 = scalar_lea.vmem %s1351_s0, %s1067_s8  ;;  %vm869_vm9 = vmand %vm867_vm6, %vm868_vm7 }
   0xf   : > { %v120_v0 = vld [vmem:[%s1193_s11 + $0x10] sm:$0x11]  ;;  %v1199_v2 = vld [vmem:[%s1193_s11] ss:$8 sps:$4 sm:$0xff]   ;;  %v1226_v36 = vld [vmem:[%s1193_s11 + $0x4] ss:$8 sps:$4 sm:$0xff]   ;;  %s116_s22 = scalar_lea.vmem %s1352_s1, %s1068_s19 }
  0x10   : > { %v1196_v1 = vcombine.low %v120_v0, %v120_v0  ;;  %999 = vmatprep.mubr.msk.bf16.mxu0 %vm133_vm0, %v1199_v2  ;;  %v1219_v32 = vcombine.high %v120_v0, %v120_v0 }
  0x12   : > { %131 = vrot.lane.b32.xlu0 %v1196_v1, %s1161_s12  ;;  %v250_v35 = vand.u32 %v1219_v32, %v1221_v34 }
  0x14   : > { %1003 = vmatprep.subr.bf16.mxu1 %v250_v35 }
  0x15   : > { %1004 = vmatpush3.bf16.msra.mxu1 %v250_v35 }
  0x16   : > { %129 = vrot.lane.b32.xlu0 %v1199_v2, %s1161_s12  ;;  %1005 = vmatprep.subr.bf16.mxu1 %v1226_v36 }
  0x19   : > { %1006 = vmatpush3.bf16.msra.mxu1 %v1226_v36 }
  0x84   : > { %v132_v3 = vpop.permute.xlu0 %131 }
  0x85   : > { %1059 = vmatprep.subr.msk.bf16.mxu0 %vm133_vm0, %v132_v3  ;;  %v144_v4 = vsel %vm133_vm0, %v132_v3, 0 }
  0x86   : > { %996 = vmatpush3.bf16.xpose.msra.mxu0 %v144_v4 }
  0x88   : > { %v130_v5 = vpop.permute.xlu0 %129 }
  0x89   : > { %1060 = vmatprep.subr.msk.bf16.mxu0 %vm133_vm0, %v130_v5  ;;  %v141_v6 = vsel %vm133_vm0, %v130_v5, 0 }
  0x8e   : > { %998 = vmatpush3.bf16.xpose.msra.mxu0 %v141_v6 }
  0x95   : > { %1000 = vmatmul.mubr.msk.bf16.vlgmr.msra.gmra.mxu0 %vm133_vm0, %v1196_v1 }
 0x155   : > { %v1001_v7 = vpop.f32.mrf.mxu0 }
 0x156   : > { %v196_v8 = vmul.f32 0.25, %v1001_v7 }
 0x157   : > { %v180_v9 = vpop.f32.mrf.mxu0 }
 0x158   : > { %v194_v10 = vmul.f32 0.25, %v180_v9  ;;  %v205_v11 = vsel %vm204_vm1, %v196_v8, -inf }
 0x159   : > { %206 = vmax.xlane.f32.xlu0 %v205_v11  ;;  %v1002_v12 = vpop.f32.mrf.mxu0 }
 0x15a   : > { %v198_v13 = vsel %vm197_vm2, %v194_v10, -inf }
 0x15b   : > { %199 = vmax.xlane.f32.xlu1 %v198_v13  ;;  %v183_v14 = vpop.f32.mrf.mxu0 }
 0x15c   : > { %v195_v15 = vmul.f32 0.25, %v183_v14 }
 0x15e   : > { %v201_v16 = vsel %vm197_vm2, %v195_v15, -inf }
 0x15f   : > { %202 = vmax.xlane.f32.xlu1 %v201_v16 }
 0x16f   : > { %300 = vrot.lane.b32.xlu0 %v1199_v2, %s1162_s13 }
 0x1e2   : > { %v207_v17 = vpop.xlane.xlu0 %206 }
 0x1e3   : > { %v210_v18 = vsub.f32 %v196_v8, %v207_v17 }
 0x1e4   : > { %v200_v19 = vpop.xlane.xlu1 %199 }
 0x1e5   : > { %v215_v20 = vmul.f32 1.442695, %v210_v18  ;;  %v208_v21 = vsub.f32 %v194_v10, %v200_v19 }
 0x1e6   : > { %v301_v50 = vpop.permute.xlu0 %300 }
 0x1e7   : > { %1105 = vpow2.f32 %v215_v20  ;;  %v211_v22 = vmul.f32 1.442695, %v208_v21 }
 0x1e8   : > { %v203_v23 = vpop.xlane.xlu1 %202 }
 0x1e9   : > { %1107 = vpow2.f32 %v211_v22  ;;  %v209_v24 = vsub.f32 %v195_v15, %v203_v23 }
 0x1eb   : > { %v213_v25 = vmul.f32 1.442695, %v209_v24 }
 0x1ed   : > { %1109 = vpow2.f32 %v213_v25 }
 0x1f4   : > { %v1106_v26 = vpop.eup %1105 }
 0x1f5   : > { %v223_v27 = vsel %vm204_vm1, %v1106_v26, 0.0 }
 0x1f6   : > { %v1108_v28 = vpop.eup %1107  ;;  %224 = vadd.xlane.f32.xlu1 %v223_v27 }
 0x1f7   : > { %v217_v29 = vsel %vm197_vm2, %v1108_v28, 0.0 }
 0x1fa   : > { %v1110_v30 = vpop.eup %1109  ;;  %218 = vadd.xlane.f32.xlu1 %v217_v29 }
 0x1fb   : > { %v220_v31 = vsel %vm197_vm2, %v1110_v30, 0.0 }
 0x1fe   : > { %221 = vadd.xlane.f32.xlu1 %v220_v31 }
 0x20f   : > { %306 = vrot.lane.b32.xlu1 %v1196_v1, %s1164_s14 }
 0x213   : > { %304 = vrot.lane.b32.xlu1 %v1199_v2, %s1164_s14 }
 0x217   : > { %302 = vrot.lane.b32.xlu1 %v1196_v1, %s1162_s13 }
 0x27f   : > { %v225_v37 = vpop.xlane.xlu1 %224 }
 0x280   : > { %1111 = vrcp.f32 %v225_v37 }
 0x283   : > { %v219_v38 = vpop.xlane.xlu1 %218 }
 0x284   : > { %1113 = vrcp.f32 %v219_v38 }
 0x287   : > { %v222_v39 = vpop.xlane.xlu1 %221 }
 0x288   : > { %1115 = vrcp.f32 %v222_v39 }
 0x28b   : > { %v307_v40 = vpop.permute.xlu1 %306 }
 0x28c   : > { %1061 = vmatprep.subr.msk.bf16.mxu1 %vm133_vm0, %v307_v40  ;;  %v318_v48 = vsel %vm133_vm0, %v307_v40, 0 }
 0x28d   : > { %v1112_v41 = vpop.eup %1111 }
 0x28e   : > { %v231_v44 = vmul.f32 %v1112_v41, %v1106_v26 }
 0x28f   : > { %v305_v51 = vpop.permute.xlu1 %304 }
 0x290   : > { %v233_v49 = vpack.c.bf16 %v231_v44, %v231_v44  ;;  %v315_v52 = vsel %vm133_vm0, %v305_v51, 0 }
 0x291   : > { %v1114_v42 = vpop.eup %1113 }
 0x292   : > { %v229_v45 = vmul.f32 %v1114_v42, %v1108_v28 }
 0x293   : > { %v303_v53 = vpop.permute.xlu1 %302 }
 0x295   : > { %v1116_v43 = vpop.eup %1115 }
 0x296   : > { %v230_v46 = vmul.f32 %v1116_v43, %v1110_v30 }
 0x298   : > { %v232_v47 = vpack.c.bf16 %v230_v46, %v229_v45 }
 0x29a   : > { %1007 = vmatprep.mubr.msk.bf16.mxu1 %vm197_vm2, %v232_v47 }
 0x29b   : > { %1008 = vmatmul.mubr.msk.bf16.vlgmr.msra.gmra.mxu1 %vm197_vm2, %v233_v49 }
 0x29c   : > { %1012 = vmatpush3.bf16.xpose.msra.mxu1 %v318_v48  ;;  %1015 = vmatprep.mubr.msk.bf16.mxu1 %vm133_vm0, %v301_v50 }
 0x29d   : > { %1062 = vmatprep.subr.msk.bf16.mxu1 %vm133_vm0, %v305_v51 }
 0x2a4   : > { %1014 = vmatpush3.bf16.xpose.msra.mxu1 %v315_v52 }
 0x2ab   : > { %1016 = vmatmul.mubr.msk.bf16.vlgmr.msra.gmra.mxu1 %vm133_vm0, %v303_v53 }
 0x35b   : > { %v1244_v54 = vpop.f32.mrf.mxu1 }
 0x35d   : > { %v1246_v55 = vpop.f32.mrf.mxu1 }
 0x35f   : > { %v1010_v56 = vpop.f32.mrf.mxu1 }
 0x361   : > { %v1248_v57 = vpop.f32.mrf.mxu1 }
 0x36b   : > { %v1017_v58 = vpop.f32.mrf.mxu1 }
 0x36c   : > { %v370_v62 = vmul.f32 0.25, %v1017_v58 }
 0x36d   : > { %v354_v59 = vpop.f32.mrf.mxu1 }
 0x36e   : > { %v368_v60 = vmul.f32 0.25, %v354_v59  ;;  %v377_v4 = vsel %vm204_vm1, %v370_v62, -inf }
 0x36f   : > { %v1018_v61 = vpop.f32.mrf.mxu1 }
 0x370   : > { %v371_v63 = vsel %vm197_vm2, %v368_v60, -inf }
 0x371   : > { %372 = vmax.xlane.f32.xlu1 %v371_v63  ;;  %v357_v0 = vpop.f32.mrf.mxu1 }
 0x372   : > { %v369_v3 = vmul.f32 0.25, %v357_v0 }
 0x374   : > { %v374_v5 = vsel %vm197_vm2, %v369_v3, -inf }
 0x375   : > { %378 = vmax.xlane.f32.xlu1 %v377_v4  ;;  %375 = vmax.xlane.f32.xlu0 %v374_v5 }
 0x386   : > { %408 = vrot.lane.b32.xlu1 %v1219_v32, %s1162_s13 }
 0x3fa   : > { %v373_v6 = vpop.xlane.xlu1 %372 }
 0x3fb   : > { %v380_v7 = vsub.f32 %v368_v60, %v373_v6 }
 0x3fd   : > { %v383_v8 = vmul.f32 1.442695, %v380_v7 }
 0x3fe   : > { %v379_v9 = vpop.xlane.xlu1 %378  ;;  %v376_v10 = vpop.xlane.xlu0 %375 }
 0x3ff   : > { %1117 = vpow2.f32 %v383_v8  ;;  %v382_v11 = vsub.f32 %v370_v62, %v379_v9  ;;  %v381_v12 = vsub.f32 %v369_v3, %v376_v10 }
 0x401   : > { %v387_v13 = vmul.f32 1.442695, %v382_v11  ;;  %v385_v14 = vmul.f32 1.442695, %v381_v12 }
 0x402   : > { %v409_v15 = vpop.permute.xlu1 %408 }
 0x403   : > { %1119 = vpow2.f32 %v387_v13  ;;  %v418_v16 = vand.u32 %v409_v15, %v1221_v34 }
 0x404   : > { %1121 = vpow2.f32 %v385_v14 }
 0x405   : > { %1019 = vmatprep.subr.bf16.mxu0 %v418_v16 }
 0x406   : > { %1020 = vmatpush3.bf16.msra.mxu0 %v418_v16 }
 0x40c   : > { %v1118_v17 = vpop.eup %1117 }
 0x40d   : > { %v389_v18 = vsel %vm197_vm2, %v1118_v17, 0.0 }
 0x40e   : > { %390 = vadd.xlane.f32.xlu1 %v389_v18 }
 0x410   : > { %v1120_v19 = vpop.eup %1119 }
 0x411   : > { %v1122_v20 = vpop.eup %1121  ;;  %v395_v21 = vsel %vm204_vm1, %v1120_v19, 0.0 }
 0x412   : > { %396 = vadd.xlane.f32.xlu0 %v395_v21  ;;  %v392_v22 = vsel %vm197_vm2, %v1122_v20, 0.0 }
 0x413   : > { %393 = vadd.xlane.f32.xlu1 %v392_v22 }
 0x424   : > { %474 = vrot.lane.b32.xlu1 %v1196_v1, %s1165_s15 }
 0x428   : > { %406 = vrot.lane.b32.xlu0 %v1226_v36, %s1162_s13  ;;  %472 = vrot.lane.b32.xlu1 %v1199_v2, %s1165_s15 }
 0x42c   : > { %468 = vrot.lane.b32.xlu0 %v1199_v2, %s1166_s16  ;;  %470 = vrot.lane.b32.xlu1 %v1196_v1, %s1166_s16 }
 0x497   : > { %v391_v23 = vpop.xlane.xlu1 %390 }
 0x498   : > { %1123 = vrcp.f32 %v391_v23 }
 0x49b   : > { %v397_v24 = vpop.xlane.xlu0 %396 }
 0x49c   : > { %v394_v25 = vpop.xlane.xlu1 %393  ;;  %1125 = vrcp.f32 %v397_v24 }
 0x49d   : > { %1127 = vrcp.f32 %v394_v25 }
 0x49f   : > { %v407_v26 = vpop.permute.xlu0 %406 }
 0x4a0   : > { %1021 = vmatprep.subr.bf16.mxu0 %v407_v26  ;;  %v475_v27 = vpop.permute.xlu1 %474 }
 0x4a1   : > { %1022 = vmatpush3.bf16.msra.mxu0 %v407_v26  ;;  %v486_v39 = vsel %vm133_vm0, %v475_v27, 0 }
 0x4a2   : > { %1063 = vmatprep.subr.msk.bf16.mxu0 %vm133_vm0, %v475_v27 }
 0x4a3   : > { %v469_v40 = vpop.permute.xlu0 %468 }
 0x4a4   : > { %v473_v41 = vpop.permute.xlu1 %472 }
 0x4a5   : > { %v1124_v28 = vpop.eup %1123  ;;  %v483_v42 = vsel %vm133_vm0, %v473_v41, 0 }
 0x4a6   : > { %v401_v33 = vmul.f32 %v1124_v28, %v1118_v17 }
 0x4a8   : > { %v471_v43 = vpop.permute.xlu1 %470 }
 0x4a9   : > { %v1126_v29 = vpop.eup %1125 }
 0x4aa   : > { %v1128_v30 = vpop.eup %1127  ;;  %v403_v31 = vmul.f32 %v1126_v29, %v1120_v19 }
 0x4ab   : > { %v402_v35 = vmul.f32 %v1128_v30, %v1122_v20 }
 0x4ac   : > { %v405_v37 = vpack.c.bf16 %v403_v31, %v403_v31 }
 0x4ad   : > { %v404_v38 = vpack.c.bf16 %v402_v35, %v401_v33 }
 0x4af   : > { %1023 = vmatprep.mubr.msk.bf16.mxu0 %vm197_vm2, %v404_v38 }
 0x4b0   : > { %1024 = vmatmul.mubr.msk.bf16.vlgmr.msra.gmra.mxu0 %vm197_vm2, %v405_v37 }
 0x4b1   : > { %1028 = vmatpush3.bf16.xpose.msra.mxu0 %v486_v39  ;;  %1031 = vmatprep.mubr.msk.bf16.mxu0 %vm133_vm0, %v469_v40 }
 0x4b2   : > { %1064 = vmatprep.subr.msk.bf16.mxu0 %vm133_vm0, %v473_v41 }
 0x4b9   : > { %1030 = vmatpush3.bf16.xpose.msra.mxu0 %v483_v42 }
 0x4c0   : > { %1032 = vmatmul.mubr.msk.bf16.vlgmr.msra.gmra.mxu0 %vm133_vm0, %v471_v43 }
 0x570   : > { %v1277_v44 = vpop.f32.mrf.mxu0 }
 0x572   : > { %v1279_v45 = vpop.f32.mrf.mxu0 }
 0x573   : > { %v1085_v46 = vpack.i.bf16 %v1279_v45, %v1277_v44 }
 0x574   : > { %v1026_v47 = vpop.f32.mrf.mxu0 }
 0x576   : > { %v1283_v48 = vpop.f32.mrf.mxu0 }
 0x580   : > { %v1033_v49 = vpop.f32.mrf.mxu0 }
 0x581   : > { %v538_v53 = vmul.f32 0.25, %v1033_v49 }
 0x582   : > { %v522_v50 = vpop.f32.mrf.mxu0 }
 0x583   : > { %v536_v51 = vmul.f32 0.25, %v522_v50  ;;  %v545_v60 = vsel %vm204_vm1, %v538_v53, -inf }
 0x584   : > { %v1034_v52 = vpop.f32.mrf.mxu0 }
 0x585   : > { %v539_v56 = vsel %vm197_vm2, %v536_v51, -inf }
 0x586   : > { %540 = vmax.xlane.f32.xlu0 %v539_v56  ;;  %v525_v58 = vpop.f32.mrf.mxu0 }
 0x587   : > { %v537_v59 = vmul.f32 0.25, %v525_v58 }
 0x589   : > { %v542_v61 = vsel %vm197_vm2, %v537_v59, -inf }
 0x58a   : > { %546 = vmax.xlane.f32.xlu0 %v545_v60  ;;  %543 = vmax.xlane.f32.xlu1 %v542_v61 }
 0x59b   : > { %576 = vrot.lane.b32.xlu1 %v1219_v32, %s1166_s16 }
 0x60f   : > { %v541_v62 = vpop.xlane.xlu0 %540 }
 0x610   : > { %v548_v63 = vsub.f32 %v536_v51, %v541_v62 }
 0x612   : > { %v551_v6 = vmul.f32 1.442695, %v548_v63 }
 0x613   : > { %v547_v0 = vpop.xlane.xlu0 %546  ;;  %v544_v3 = vpop.xlane.xlu1 %543 }
 0x614   : > { %v550_v4 = vsub.f32 %v538_v53, %v547_v0  ;;  %v549_v5 = vsub.f32 %v537_v59, %v544_v3 }
 0x616   : > { %v555_v7 = vmul.f32 1.442695, %v550_v4  ;;  %v553_v8 = vmul.f32 1.442695, %v549_v5 }
 0x617   : > { %v577_v9 = vpop.permute.xlu1 %576 }
 0x618   : > { %1129 = vpow2.f32 %v555_v7  ;;  %v586_v10 = vand.u32 %v577_v9, %v1221_v34 }
 0x619   : > { %1131 = vpow2.f32 %v553_v8 }
 0x61a   : > { %1133 = vpow2.f32 %v551_v6  ;;  %1035 = vmatprep.subr.bf16.mxu1 %v586_v10 }
 0x61b   : > { %1036 = vmatpush3.bf16.msra.mxu1 %v586_v10 }
 0x625   : > { %v1130_v11 = vpop.eup %1129 }
 0x626   : > { %v1132_v12 = vpop.eup %1131  ;;  %v563_v13 = vsel %vm204_vm1, %v1130_v11, 0.0 }
 0x627   : > { %v1134_v14 = vpop.eup %1133  ;;  %564 = vadd.xlane.f32.xlu0 %v563_v13  ;;  %v560_v15 = vsel %vm197_vm2, %v1132_v12, 0.0 }
 0x628   : > { %561 = vadd.xlane.f32.xlu1 %v560_v15  ;;  %v557_v16 = vsel %vm197_vm2, %v1134_v14, 0.0 }
 0x62b   : > { %558 = vadd.xlane.f32.xlu0 %v557_v16 }
 0x639   : > { %642 = vrot.lane.b32.xlu1 %v1196_v1, %s1167_s17 }
 0x63d   : > { %640 = vrot.lane.b32.xlu1 %v1199_v2, %s1167_s17 }
 0x641   : > { %574 = vrot.lane.b32.xlu0 %v1226_v36, %s1166_s16  ;;  %638 = vrot.lane.b32.xlu1 %v1196_v1, %s1168_s18 }
 0x645   : > { %636 = vrot.lane.b32.xlu0 %v1199_v2, %s1168_s18 }
 0x6b0   : > { %v565_v17 = vpop.xlane.xlu0 %564 }
 0x6b1   : > { %v562_v18 = vpop.xlane.xlu1 %561  ;;  %1135 = vrcp.f32 %v565_v17 }
 0x6b2   : > { %1137 = vrcp.f32 %v562_v18 }
 0x6b4   : > { %v559_v19 = vpop.xlane.xlu0 %558 }
 0x6b5   : > { %1139 = vrcp.f32 %v559_v19  ;;  %v643_v21 = vpop.permute.xlu1 %642 }
 0x6b6   : > { %v654_v2 = vsel %vm133_vm0, %v643_v21, 0 }
 0x6b8   : > { %v575_v20 = vpop.permute.xlu0 %574 }
 0x6b9   : > { %1037 = vmatprep.subr.bf16.mxu1 %v575_v20  ;;  %v641_v30 = vpop.permute.xlu1 %640 }
 0x6ba   : > { %1038 = vmatpush3.bf16.msra.mxu1 %v575_v20  ;;  %v651_v31 = vsel %vm133_vm0, %v641_v30, 0 }
 0x6bb   : > { %1065 = vmatprep.subr.msk.bf16.mxu1 %vm133_vm0, %v643_v21 }
 0x6bc   : > { %v637_v29 = vpop.permute.xlu0 %636 }
 0x6bd   : > { %v639_v33 = vpop.permute.xlu1 %638 }
 0x6be   : > { %v1136_v22 = vpop.eup %1135 }
 0x6bf   : > { %v1138_v23 = vpop.eup %1137  ;;  %v571_v25 = vmul.f32 %v1136_v22, %v1130_v11 }
 0x6c0   : > { %v570_v26 = vmul.f32 %v1138_v23, %v1132_v12 }
 0x6c1   : > { %v573_v28 = vpack.c.bf16 %v571_v25, %v571_v25 }
 0x6c2   : > { %v1140_v24 = vpop.eup %1139 }
 0x6c3   : > { %v569_v1 = vmul.f32 %v1140_v24, %v1134_v14 }
 0x6c5   : > { %v572_v27 = vpack.c.bf16 %v570_v26, %v569_v1 }
 0x6c7   : > { %1039 = vmatprep.mubr.msk.bf16.mxu1 %vm197_vm2, %v572_v27 }
 0x6c8   : > { %1040 = vmatmul.mubr.msk.bf16.vlgmr.msra.gmra.mxu1 %vm197_vm2, %v573_v28 }
 0x6c9   : > { %1044 = vmatpush3.bf16.xpose.msra.mxu1 %v654_v2  ;;  %1047 = vmatprep.mubr.msk.bf16.mxu1 %vm133_vm0, %v637_v29 }
 0x6ca   : > { %1066 = vmatprep.subr.msk.bf16.mxu1 %vm133_vm0, %v641_v30 }
 0x6d1   : > { %1046 = vmatpush3.bf16.xpose.msra.mxu1 %v651_v31 }
 0x6d8   : > { %1048 = vmatmul.mubr.msk.bf16.vlgmr.msra.gmra.mxu1 %vm133_vm0, %v639_v33 }
 0x788   : > { %v1041_v35 = vpop.f32.mrf.mxu1 }
 0x78a   : > { %v622_v37 = vpop.f32.mrf.mxu1 }
 0x78b   : > { %v1090_v38 = vpack.i.bf16 %v622_v37, %v1041_v35 }
 0x78c   : > { %v1042_v39 = vpop.f32.mrf.mxu1 }
 0x78e   : > { %v625_v40 = vpop.f32.mrf.mxu1 }
 0x798   : > { %v1049_v41 = vpop.f32.mrf.mxu1 }
 0x799   : > { %v706_v49 = vmul.f32 0.25, %v1049_v41  ;;  %v870_v41 = vld [vmem:[%s116_s22 + $0x8] sm:$0x1] }
 0x79a   : > { %v690_v42 = vpop.f32.mrf.mxu1 }
 0x79b   : > { %v704_v43 = vmul.f32 0.25, %v690_v42  ;;  %v713_v53 = vsel %vm204_vm1, %v706_v49, -inf }
 0x79c   : > { %v1050_v47 = vpop.f32.mrf.mxu1 }
 0x79d   : > { %v707_v50 = vsel %vm197_vm2, %v704_v43, -inf }
 0x79e   : > { %708 = vmax.xlane.f32.xlu0 %v707_v50  ;;  %v693_v51 = vpop.f32.mrf.mxu1 }
 0x79f   : > { %v705_v52 = vmul.f32 0.25, %v693_v51 }
 0x7a1   : > { %v710_v56 = vsel %vm197_vm2, %v705_v52, -inf }
 0x7a2   : > { %714 = vmax.xlane.f32.xlu0 %v713_v53  ;;  %711 = vmax.xlane.f32.xlu1 %v710_v56 }
 0x827   : > { %v709_v58 = vpop.xlane.xlu0 %708 }
 0x828   : > { %v716_v59 = vsub.f32 %v704_v43, %v709_v58 }
 0x82a   : > { %v719_v0 = vmul.f32 1.442695, %v716_v59 }
 0x82b   : > { %v715_v60 = vpop.xlane.xlu0 %714  ;;  %v712_v61 = vpop.xlane.xlu1 %711 }
 0x82c   : > { %v718_v62 = vsub.f32 %v706_v49, %v715_v60  ;;  %v717_v63 = vsub.f32 %v705_v52, %v712_v61 }
 0x82e   : > { %v723_v3 = vmul.f32 1.442695, %v718_v62  ;;  %v721_v4 = vmul.f32 1.442695, %v717_v63 }
 0x830   : > { %1141 = vpow2.f32 %v723_v3 }
 0x831   : > { %1143 = vpow2.f32 %v721_v4 }
 0x832   : > { %1145 = vpow2.f32 %v719_v0 }
 0x83d   : > { %v1142_v5 = vpop.eup %1141 }
 0x83e   : > { %v1144_v6 = vpop.eup %1143  ;;  %v731_v7 = vsel %vm204_vm1, %v1142_v5, 0.0 }
 0x83f   : > { %v1146_v8 = vpop.eup %1145  ;;  %732 = vadd.xlane.f32.xlu0 %v731_v7  ;;  %v728_v9 = vsel %vm197_vm2, %v1144_v6, 0.0 }
 0x840   : > { %729 = vadd.xlane.f32.xlu1 %v728_v9  ;;  %v725_v10 = vsel %vm197_vm2, %v1146_v8, 0.0 }
 0x843   : > { %726 = vadd.xlane.f32.xlu0 %v725_v10 }
 0x851   : > { %744 = vrot.lane.b32.xlu1 %v1219_v32, %s1168_s18 }
 0x855   : > { %1086 = vrot.lane.b32.xlu1 %v1085_v46, %s1167_s17 }
 0x859   : > { %809 = vrot.lane.b32.xlu1 %v1283_v48, %s1167_s17  ;;  %742 = vrot.lane.b32.xlu0 %v1226_v36, %s1168_s18 }
 0x85d   : > { %821 = vrot.lane.b32.xlu1 %v625_v40, %s1165_s15  ;;  %1091 = vrot.lane.b32.xlu0 %v1090_v38, %s1165_s15 }
 0x8c8   : > { %v733_v11 = vpop.xlane.xlu0 %732 }
 0x8c9   : > { %v730_v12 = vpop.xlane.xlu1 %729  ;;  %1147 = vrcp.f32 %v733_v11 }
 0x8ca   : > { %1149 = vrcp.f32 %v730_v12 }
 0x8cc   : > { %v727_v32 = vpop.xlane.xlu0 %726 }
 0x8cd   : > { %1151 = vrcp.f32 %v727_v32  ;;  %v745_v13 = vpop.permute.xlu1 %744 }
 0x8ce   : > { %v754_v44 = vand.u32 %v745_v13, %v1221_v34 }
 0x8d0   : > { %1051 = vmatprep.subr.bf16.mxu0 %v754_v44  ;;  %v743_v45 = vpop.permute.xlu0 %742 }
 0x8d1   : > { %1052 = vmatpush3.bf16.msra.mxu0 %v754_v44  ;;  %v1087_v23 = vpop.permute.xlu1 %1086 }
 0x8d2   : > { %1053 = vmatprep.subr.bf16.mxu0 %v743_v45  ;;  %v1089_v1 = vunpack.i.h.bf16 %v1087_v23  ;;  %v1088_v26 = vunpack.i.l.bf16 %v1087_v23 }
 0x8d4   : > { %v1092_v25 = vpop.permute.xlu0 %1091  ;;  %v840_v29 = vsel %vm133_vm0, %v1246_v55, %v1089_v1  ;;  %v842_v31 = vsel %vm133_vm0, %v1244_v54, %v1088_v26 }
 0x8d5   : > { %1054 = vmatpush3.bf16.msra.mxu0 %v743_v45  ;;  %v810_v24 = vpop.permute.xlu1 %809  ;;  %v1094_v27 = vunpack.i.h.bf16 %v1092_v25  ;;  %v1093_v2 = vunpack.i.l.bf16 %v1092_v25 }
 0x8d6   : > { %v1148_v46 = vpop.eup %1147  ;;  %v841_v33 = vsel %vm133_vm0, %v1248_v57, %v810_v24 }
 0x8d7   : > { %v1150_v36 = vpop.eup %1149  ;;  %v739_v14 = vmul.f32 %v1148_v46, %v1142_v5  ;;  %v844_v38 = vsel %vm843_vm4, %v840_v29, %v1094_v27  ;;  %v846_v40 = vsel %vm843_vm4, %v842_v31, %v1093_v2 }
 0x8d8   : > { %v738_v16 = vmul.f32 %v1150_v36, %v1144_v6 }
 0x8d9   : > { %v741_v18 = vpack.c.bf16 %v739_v14, %v739_v14  ;;  %v822_v28 = vpop.permute.xlu1 %821 }
 0x8da   : > { %v1152_v48 = vpop.eup %1151  ;;  %v845_v39 = vsel %vm843_vm4, %v841_v33, %v822_v28 }
 0x8db   : > { %v737_v15 = vmul.f32 %v1152_v48, %v1146_v8 }
 0x8dd   : > { %v740_v17 = vpack.c.bf16 %v738_v16, %v737_v15 }
 0x8df   : > { %1055 = vmatprep.mubr.msk.bf16.mxu0 %vm197_vm2, %v740_v17 }
 0x8e0   : > { %1056 = vmatmul.mubr.msk.bf16.vlgmr.msra.gmra.mxu0 %vm197_vm2, %v741_v18 }
 0x9a0   : > { %v1057_v19 = vpop.f32.mrf.mxu0 }
 0x9a2   : > { %v790_v34 = vpop.f32.mrf.mxu0 }
 0x9a3   : > { %v1095_v20 = vpack.i.bf16 %v790_v34, %v1057_v19 }
 0x9a4   : > { %v1058_v21 = vpop.f32.mrf.mxu0 }
 0x9a5   : > { %1096 = vrot.lane.b32.xlu0 %v1095_v20, %s1164_s14 }
 0x9a6   : > { %v793_v22 = vpop.f32.mrf.mxu0 }
 0x9a7   : > { %833 = vrot.lane.b32.xlu1 %v793_v22, %s1164_s14 }
 0xa17   : > { %v1097_v30 = vpop.permute.xlu0 %1096 }
 0xa18   : > { %v1099_v35 = vunpack.i.h.bf16 %v1097_v30  ;;  %v1098_v37 = vunpack.i.l.bf16 %v1097_v30 }
 0xa19   : > { %v834_v55 = vpop.permute.xlu1 %833 }
 0xa1a   : > { %v848_v42 = vsel %vm847_vm5, %v844_v38, %v1099_v35  ;;  %v849_v43 = vsel %vm847_vm5, %v845_v39, %v834_v55  ;;  %v850_v47 = vsel %vm847_vm5, %v846_v40, %v1098_v37 }
 0xa1b   : > { %v960_v49 = vpack.c.bf16 %v848_v42, %v848_v42  ;;  %v961_v54 = vpack.c.bf16 %v849_v43, %v849_v43  ;;  %v962_v50 = vpack.c.bf16 %v850_v47, %v850_v47 }
 0xa1d   : > { %865 = vst.msk [vmem:[%s116_s22] sm:$0xf] %vm864_vm8, %v960_v49  ;;  %866 = vst.msk [vmem:[%s116_s22 + $0x4] sm:$0xf] %vm864_vm8, %v961_v54  ;;  %v871_v57 = vsel %vm869_vm9, %v962_v50, %v870_v41 }
 0xa1e   : > { %872 = vst [vmem:[%s116_s22 + $0x8] sm:$0x1] %v871_v57 }
 0xa1f PF: > { %s11_s6 = sadd.s32 1, %s1159_s6  }
 0xa20   : > { %p8_p4 = scmp.ge.s32.totalorder %s11_s6, 4  }
 0xa22   :  { %10 = sbr.rel (!%p8_p4) target bundleno = 1 (0x1), region = 54 }

// kernel: clip_vit_forward.27
= control target key start
LH: loop header
LB: loop body
LE: loop exit
PB: predicated region body
PF: predicated region fallthrough
CT: control target
= control target key end

     0   :  { %v262_v0 = vmov 0.0   ;;  %vm263_vm0 = vmmov 0   ;;  %vm75_vm1 = vcmask 523264   ;;  %vm177_vm2 = vcmask 519168   ;;  %s344_s1 = inlined_call_operand.vmem [shape: bf16[64,64], index: 1, kind: input, shape index: {}]   ;;  %s345_s0 = inlined_call_operand.vmem [shape: bf16[34,64], index: 0, kind: input, shape index: {}]   ;;  %s346_s3 = inlined_call_operand.vmem [shape: bf16[34,64], index: 3, kind: input, shape index: {}]   ;;  %s347_s2 = inlined_call_operand.vmem [shape: f32[1,64], index: 2, kind: input, shape index: {}]   ;;  %s348_s4 = inlined_call_operand.vmem [shape: bf16[34,64], index: 4, kind: output, shape index: {}]  }
   0x1   :  { %225 = vmatprep.subr.bf16.mxu0 %v262_v0  ;;  %245 = vmatprep.subr.bf16.mxu1 %v262_v0  ;;  %v255_v1 = vld [vmem:[%s344_s1 + $0x18] sm:$0xff]   ;;  %v256_v2 = vld [vmem:[%s344_s1 + $0x10] sm:$0xff]   ;;  %v257_v3 = vld [vmem:[%s344_s1 + $0x8] sm:$0xff]   ;;  %vm182_vm3 = vcmask 516096  }
   0x2   :  { %233 = vmatprep.mubr.msk.bf16.mxu0 %vm263_vm0, %v262_v0  ;;  %237 = vmatprep.mubr.msk.bf16.mxu1 %vm263_vm0, %v262_v0  ;;  %v258_v4 = vld [vmem:[%s344_s1] sm:$0xff]   ;;  %v260_v6 = vld [vmem:[%s345_s0 + $0x8] sm:$0xff]   ;;  %v261_v7 = vld [vmem:[%s345_s0 + $0x10] ss:$0 sps:$4 sm:$0x11]  }
   0x3   :  { %226 = vmatpush3.bf16.msra.mxu0 %v255_v1  ;;  %249 = vmatpush3.bf16.msra.mxu1 %v255_v1  ;;  %v259_v5 = vld [vmem:[%s345_s0] sm:$0xff]   ;;  %v217_v9 = vld [vmem:[%s346_s3 + $0x8] sm:$0xff]   ;;  %v145_v25 = vld [vmem:[%s346_s3 + $0x10] sm:$0x1] }
   0x4   :  { %227 = vmatprep.subr.bf16.mxu0 %v262_v0  ;;  %246 = vmatprep.subr.bf16.mxu1 %v262_v0  ;;  %v210_v8 = vld [vmem:[%s346_s3] sm:$0xff]   ;;  %v215_v12 = vunpack.c.l.bf16 %v217_v9  ;;  %v216_v22 = vunpack.c.h.bf16 %v217_v9  ;;  %v150_v34 = vunpack.c.l.bf16 %v145_v25 }
   0x5   :  { %v188_v10 = vld [vmem:[%s347_s2] ss:$0 sm:$0xff]  ;;  %v211_v11 = vunpack.c.l.bf16 %v210_v8  ;;  %v212_v21 = vunpack.c.h.bf16 %v210_v8 }
   0x7   :  { %228 = vmatpush3.bf16.msra.mxu0 %v256_v2  ;;  %250 = vmatpush3.bf16.msra.mxu1 %v256_v2 }
   0x8   :  { %229 = vmatprep.subr.bf16.mxu0 %v262_v0  ;;  %247 = vmatprep.subr.bf16.mxu1 %v262_v0 }
   0xb   :  { %230 = vmatpush3.bf16.msra.mxu0 %v257_v3  ;;  %251 = vmatpush3.bf16.msra.mxu1 %v257_v3 }
   0xc   :  { %231 = vmatprep.subr.bf16.mxu0 %v262_v0  ;;  %248 = vmatprep.subr.bf16.mxu1 %v262_v0 }
   0xf   :  { %232 = vmatpush3.bf16.msra.mxu0 %v258_v4  ;;  %252 = vmatpush3.bf16.msra.mxu1 %v258_v4 }
  0x12   :  { %234 = vmatmul.mubr.msk.bf16.vlgmr.msra.gmra.mxu0 %vm75_vm1, %v259_v5  ;;  %238 = vmatmul.mubr.msk.bf16.vlgmr.msra.gmra.mxu1 %vm75_vm1, %v260_v6 }
  0x13   :  { %241 = vmatprep.mubr.msk.bf16.mxu1 %vm263_vm0, %v262_v0 }
  0x1a   :  { %242 = vmatmul.mubr.msk.bf16.gmra.mxu1 %vm75_vm1, %v261_v7 }
  0xd2   :  { %v119_v13 = vpop.f32.mrf.mxu0  ;;  %v127_v14 = vpop.f32.mrf.mxu1 }
  0xd3   :  { %v120_v15 = vadd.f32 %v188_v10, %v119_v13  ;;  %v128_v16 = vadd.f32 %v188_v10, %v127_v14 }
  0xd4   :  { %v235_v17 = vpop.f32.mrf.mxu0  ;;  %v239_v18 = vpop.f32.mrf.mxu1 }
  0xd5   :  { %v151_v19 = vadd.f32 %v211_v11, %v120_v15  ;;  %v153_v20 = vadd.f32 %v215_v12, %v128_v16 }
  0xd6   :  { %v122_v23 = vpop.f32.mrf.mxu0  ;;  %v130_v24 = vpop.f32.mrf.mxu1 }
  0xd7   :  { %v204_v26 = vpack.c.bf16 %v151_v19, %v151_v19  ;;  %v206_v27 = vpack.c.bf16 %v153_v20, %v153_v20  ;;  %v123_v28 = vadd.f32 %v188_v10, %v122_v23  ;;  %v131_v29 = vadd.f32 %v188_v10, %v130_v24 }
  0xd8   :  { %v236_v30 = vpop.f32.mrf.mxu0  ;;  %v240_v31 = vpop.f32.mrf.mxu1 }
  0xd9   :  { %178 = vst.msk [vmem:[%s348_s4] sm:$0xf] %vm177_vm2, %v204_v26  ;;  %180 = vst.msk [vmem:[%s348_s4 + $0x8] sm:$0xf] %vm177_vm2, %v206_v27  ;;  %v152_v32 = vadd.f32 %v212_v21, %v123_v28  ;;  %v154_v33 = vadd.f32 %v216_v22, %v131_v29 }
  0xda   :  { %v135_v35 = vpop.f32.mrf.mxu1 }
  0xdb   :  { %v205_v36 = vpack.c.bf16 %v152_v32, %v152_v32  ;;  %v207_v37 = vpack.c.bf16 %v154_v33, %v154_v33  ;;  %v136_v38 = vadd.f32 %v188_v10, %v135_v35 }
  0xdc   :  { %v243_v39 = vpop.f32.mrf.mxu1 }
  0xdd   :  { %179 = vst.msk [vmem:[%s348_s4 + $0x4] sm:$0xf] %vm177_vm2, %v205_v36  ;;  %181 = vst.msk [vmem:[%s348_s4 + $0xc] sm:$0xf] %vm177_vm2, %v207_v37  ;;  %v155_v40 = vadd.f32 %v150_v34, %v136_v38 }
  0xde   :  { %v138_v41 = vpop.f32.mrf.mxu1 }
  0xdf   :  { %v208_v42 = vpack.c.bf16 %v155_v40, %v155_v40 }
  0xe0   :  { %v244_v43 = vpop.f32.mrf.mxu1 }
  0xe1   :  { %183 = vst.msk [vmem:[%s348_s4 + $0x10] sm:$0x1] %vm182_vm3, %v208_v42 }

// kernel: clip_vit_forward.28
= control target key start
LH: loop header
LB: loop body
LE: loop exit
PB: predicated region body
PF: predicated region fallthrough
CT: control target
= control target key end

     0   :  { %vm31_vm0 = vcmask 523264   ;;  %vm44_vm1 = vcmask 517120   ;;  %v490_v40 = vmov 0   ;;  %s659_s0 = inlined_call_operand.vmem [shape: bf16[34,64], index: 0, kind: input, shape index: {}]   ;;  %s660_s3 = inlined_call_operand.vmem [shape: bf16[64,256], index: 3, kind: input, shape index: {}]   ;;  %s661_s1 = inlined_call_operand.vmem [shape: f32[1,64], index: 1, kind: input, shape index: {}]   ;;  %s662_s2 = inlined_call_operand.vmem [shape: f32[1,64], index: 2, kind: input, shape index: {}]   ;;  %s663_s4 = inlined_call_operand.vmem [shape: f32[1,256], index: 4, kind: input, shape index: {}]   ;;  %s664_s5 = inlined_call_operand.vmem [shape: bf16[34,256], index: 5, kind: output, shape index: {}]  }
   0x1   :  { %v418_v0 = vld [vmem:[%s659_s0 + $0x8] sm:$0xff]   ;;  %v411_v1 = vld [vmem:[%s659_s0] sm:$0xff]   ;;  %v25_v5 = vld [vmem:[%s659_s0 + $0x10] sm:$0x1]  ;;  %237 = vmatprep.mubr.bf16.mxu1 %v490_v40  ;;  %227 = vmatprep.mubr.bf16.mxu0 %v490_v40 }
   0x2   :  { %v416_v2 = vunpack.c.l.bf16 %v418_v0  ;;  %v417_v3 = vunpack.c.h.bf16 %v418_v0  ;;  %v412_v4 = vunpack.c.l.bf16 %v411_v1  ;;  %v413_v6 = vunpack.c.h.bf16 %v411_v1  ;;  %v428_v38 = vld [vmem:[%s660_s3 + $0x34] ss:$8 sps:$4 sm:$0xff]   ;;  %v430_v39 = vld [vmem:[%s660_s3 + $0x30] ss:$8 sps:$4 sm:$0xff]   ;;  %v431_v41 = vld [vmem:[%s660_s3 + $0x24] ss:$8 sps:$4 sm:$0xff]  }
   0x3   :  { %v30_v10 = vunpack.c.l.bf16 %v25_v5  ;;  %419 = vmatprep.subr.bf16.mxu1 %v428_v38  ;;  %203 = vmatprep.subr.bf16.mxu0 %v428_v38  ;;  %v433_v42 = vld [vmem:[%s660_s3 + $0x20] ss:$8 sps:$4 sm:$0xff]   ;;  %v434_v43 = vld [vmem:[%s660_s3 + $0x14] ss:$8 sps:$4 sm:$0xff]   ;;  %v436_v44 = vld [vmem:[%s660_s3 + $0x10] ss:$8 sps:$4 sm:$0xff]  }
   0x4   :  { %v38_v7 = vsel %vm31_vm0, %v416_v2, 0.0  ;;  %v32_v8 = vsel %vm31_vm0, %v412_v4, 0.0  ;;  %v41_v9 = vsel %vm31_vm0, %v417_v3, 0.0  ;;  %v35_v11 = vsel %vm31_vm0, %v413_v6, 0.0  ;;  %423 = vmatpush1.bf16.msra.mxu1 %v430_v39  ;;  %204 = vmatpush1.bf16.msra.mxu0 %v430_v39  ;;  %v437_v45 = vld [vmem:[%s660_s3 + $0x4] ss:$8 sps:$4 sm:$0xff]  }
   0x5   :  { %39 = vadd.xlane.f32.xlu0 %v38_v7  ;;  %33 = vadd.xlane.f32.xlu1 %v32_v8  ;;  %v45_v12 = vsel %vm44_vm1, %v30_v10, 0.0  ;;  %v439_v46 = vld [vmem:[%s660_s3] ss:$8 sps:$4 sm:$0xff]  }
   0x6   :  { %420 = vmatprep.subr.bf16.mxu1 %v431_v41  ;;  %205 = vmatprep.subr.bf16.mxu0 %v431_v41  ;;  %v377_v0 = vld [vmem:[%s661_s1] ss:$0 sm:$0xff] }
   0x7   :  { %v378_v5 = vld [vmem:[%s662_s2] ss:$0 sm:$0xff] }
   0x8   :  { %424 = vmatpush1.bf16.msra.mxu1 %v433_v42  ;;  %206 = vmatpush1.bf16.msra.mxu0 %v433_v42 }
   0x9   :  { %42 = vadd.xlane.f32.xlu0 %v41_v9  ;;  %36 = vadd.xlane.f32.xlu1 %v35_v11 }
   0xa   :  { %421 = vmatprep.subr.bf16.mxu1 %v434_v43  ;;  %207 = vmatprep.subr.bf16.mxu0 %v434_v43 }
   0xc   :  { %425 = vmatpush1.bf16.msra.mxu1 %v436_v44  ;;  %208 = vmatpush1.bf16.msra.mxu0 %v436_v44 }
   0xd   :  { %46 = vadd.xlane.f32.xlu0 %v45_v12  ;;  %422 = vmatprep.subr.bf16.mxu1 %v437_v45 }
   0xe   :  { %209 = vmatprep.subr.bf16.mxu0 %v437_v45 }
  0x10   :  { %426 = vmatpush1.bf16.msra.mxu1 %v439_v46  ;;  %210 = vmatpush1.bf16.msra.mxu0 %v439_v46 }
  0x8e   :  { %v40_v13 = vpop.xlane.xlu0 %39  ;;  %v34_v14 = vpop.xlane.xlu1 %33 }
  0x8f   :  { %v51_v15 = vmul.f32 0.015625, %v40_v13  ;;  %v49_v16 = vmul.f32 0.015625, %v34_v14 }
  0x91   :  { %v535_v17 = vsub.f32 %v416_v2, %v51_v15  ;;  %v537_v18 = vsub.f32 %v412_v4, %v49_v16 }
  0x92   :  { %v43_v19 = vpop.xlane.xlu0 %42  ;;  %v37_v20 = vpop.xlane.xlu1 %36 }
  0x93   :  { %v52_v21 = vmul.f32 0.015625, %v43_v19  ;;  %v61_v22 = vmul.f32 %v535_v17, %v535_v17  ;;  %v50_v23 = vmul.f32 0.015625, %v37_v20  ;;  %v59_v24 = vmul.f32 %v537_v18, %v537_v18 }
  0x95   :  { %v543_v25 = vsub.f32 %v417_v3, %v52_v21  ;;  %v70_v26 = vsel %vm31_vm0, %v61_v22, 0.0  ;;  %v546_v27 = vsub.f32 %v413_v6, %v50_v23  ;;  %v64_v31 = vsel %vm31_vm0, %v59_v24, 0.0 }
  0x96   :  { %v47_v28 = vpop.xlane.xlu0 %46  ;;  %71 = vadd.xlane.f32.xlu1 %v70_v26  ;;  %v136_v23 = vlaneseq  ;;  %v134_v26 = vld [vmem:[%s663_s4] sm:$0x3] }
  0x97   :  { %v53_v29 = vmul.f32 0.015625, %v47_v28  ;;  %v62_v30 = vmul.f32 %v543_v25, %v543_v25  ;;  %v60_v32 = vmul.f32 %v546_v27, %v546_v27 }
  0x98   :  { %v137_v24 = vshrl.u32 %v136_v23, 7 }
  0x99   :  { %v553_v33 = vsub.f32 %v30_v10, %v53_v29  ;;  %v73_v34 = vsel %vm31_vm0, %v62_v30, 0.0  ;;  %v67_v36 = vsel %vm31_vm0, %v60_v32, 0.0 }
  0x9a   :  { %74 = vadd.xlane.f32.xlu0 %v73_v34  ;;  %65 = vadd.xlane.f32.xlu1 %v64_v31 }
  0x9b   :  { %v63_v35 = vmul.f32 %v553_v33, %v553_v33 }
  0x9d   :  { %v76_v37 = vsel %vm44_vm1, %v63_v35, 0.0 }
  0x9e   :  { %77 = vadd.xlane.f32.xlu1 %v76_v37  ;;  %68 = vadd.xlane.f32.xlu0 %v67_v36 }
 0x11f   :  { %v72_v47 = vpop.xlane.xlu1 %71 }
 0x120   :  { %v81_v48 = vmul.f32 0.015625, %v72_v47 }
 0x122   :  { %v86_v49 = vadd.f32 1e-05, %v81_v48 }
 0x123   :  { %v75_v50 = vpop.xlane.xlu0 %74  ;;  %v66_v51 = vpop.xlane.xlu1 %65 }
 0x124   :  { %440 = vrsqrt.f32 %v86_v49  ;;  %v82_v52 = vmul.f32 0.015625, %v75_v50  ;;  %v79_v53 = vmul.f32 0.015625, %v66_v51 }
 0x126   :  { %v87_v54 = vadd.f32 1e-05, %v82_v52  ;;  %v84_v55 = vadd.f32 1e-05, %v79_v53 }
 0x127   :  { %v69_v56 = vpop.xlane.xlu0 %68  ;;  %v78_v57 = vpop.xlane.xlu1 %77 }
 0x128   :  { %442 = vrsqrt.f32 %v87_v54  ;;  %v80_v58 = vmul.f32 0.015625, %v69_v56  ;;  %v83_v59 = vmul.f32 0.015625, %v78_v57 }
 0x129   :  { %444 = vrsqrt.f32 %v84_v55 }
 0x12a   :  { %v85_v60 = vadd.f32 1e-05, %v80_v58  ;;  %v88_v61 = vadd.f32 1e-05, %v83_v59 }
 0x12c   :  { %446 = vrsqrt.f32 %v85_v60 }
 0x12d   :  { %448 = vrsqrt.f32 %v88_v61 }
 0x131   :  { %v441_v62 = vpop.eup %440 }
 0x132   :  { %v96_v63 = vmul.f32 %v441_v62, %v535_v17 }
 0x134   :  { %v108_v4 = vmul.f32 %v377_v0, %v96_v63 }
 0x135   :  { %v443_v1 = vpop.eup %442 }
 0x136   :  { %v445_v2 = vpop.eup %444  ;;  %v97_v3 = vmul.f32 %v443_v1, %v543_v25  ;;  %v120_v10 = vadd.f32 %v378_v5, %v108_v4  ;;  %v138_v25 = vsub.s32 0, %v137_v24 }
 0x137   :  { %v94_v6 = vmul.f32 %v445_v2, %v537_v18 }
 0x138   :  { %v109_v7 = vmul.f32 %v377_v0, %v97_v3  ;;  %v139_v28 = vrot.slane %v134_v26, %v138_v25 }
 0x139   :  { %v447_v8 = vpop.eup %446  ;;  %v106_v13 = vmul.f32 %v377_v0, %v94_v6 }
 0x13a   :  { %v449_v9 = vpop.eup %448  ;;  %v121_v11 = vadd.f32 %v378_v5, %v109_v7  ;;  %v95_v12 = vmul.f32 %v447_v8, %v546_v27  ;;  %v142_v27 = vsub.s32 1, %v137_v24 }
 0x13b   :  { %v98_v14 = vmul.f32 %v449_v9, %v553_v33  ;;  %v118_v19 = vadd.f32 %v378_v5, %v106_v13 }
 0x13c   :  { %v124_v15 = vpack.c.bf16 %v121_v11, %v120_v10  ;;  %v107_v16 = vmul.f32 %v377_v0, %v95_v12  ;;  %v143_v29 = vrot.slane %v134_v26, %v142_v27 }
 0x13d   :  { %v110_v17 = vmul.f32 %v377_v0, %v98_v14 }
 0x13e   :  { %388 = vmatmul.mubr.msk.bf16.vlgmr.msra.gmra.mxu1 %vm31_vm0, %v124_v15  ;;  %v119_v20 = vadd.f32 %v378_v5, %v107_v16 }
 0x13f   :  { %247 = vmatprep.mubr.bf16.mxu1 %v490_v40  ;;  %v122_v21 = vadd.f32 %v378_v5, %v110_v17 }
 0x140   :  { %v123_v18 = vpack.c.bf16 %v119_v20, %v118_v19 }
 0x141   :  { %v125_v22 = vpack.c.bf16 %v122_v21, %v122_v21 }
 0x142   :  { %387 = vmatmul.mubr.msk.bf16.vlgmr.msra.gmra.mxu0 %vm31_vm0, %v123_v18 }
 0x146   :  { %389 = vmatmul.mubr.msk.bf16.gmra.mxu1 %vm31_vm0, %v125_v22 }
 0x1fe   :  { %v239_v30 = vpop.f32.mrf.mxu1 }
 0x1ff   :  { %v604_v31 = vadd.f32 %v239_v30, %v139_v28 }
 0x200   :  { %v241_v32 = vpop.f32.mrf.mxu1 }
 0x201   :  { %v394_v33 = vmul.f32 -1.702, %v604_v31  ;;  %v607_v34 = vadd.f32 %v241_v32, %v143_v29 }
 0x202   :  { %v229_v35 = vpop.f32.mrf.mxu0  ;;  %v243_v36 = vpop.f32.mrf.mxu1 }
 0x203   :  { %v284_v37 = vmul.f32 1.442695, %v394_v33  ;;  %v395_v38 = vmul.f32 -1.702, %v607_v34  ;;  %v610_v39 = vadd.f32 %v229_v35, %v139_v28  ;;  %v612_v40 = vadd.f32 %v243_v36, %v139_v28 }
 0x204   :  { %v231_v41 = vpop.f32.mrf.mxu0  ;;  %v245_v42 = vpop.f32.mrf.mxu1 }
 0x205   :  { %450 = vpow2.f32 %v284_v37  ;;  %v286_v43 = vmul.f32 1.442695, %v395_v38  ;;  %v390_v44 = vmul.f32 -1.702, %v610_v39  ;;  %v396_v45 = vmul.f32 -1.702, %v612_v40 }
 0x206   :  { %v616_v46 = vadd.f32 %v231_v41, %v143_v29  ;;  %v618_v47 = vadd.f32 %v245_v42, %v143_v29  ;;  %v233_v48 = vpop.f32.mrf.mxu0  ;;  %v249_v49 = vpop.f32.mrf.mxu1 }
 0x207   :  { %452 = vpow2.f32 %v286_v43  ;;  %v276_v50 = vmul.f32 1.442695, %v390_v44  ;;  %v288_v51 = vmul.f32 1.442695, %v396_v45  ;;  %v620_v52 = vadd.f32 %v233_v48, %v139_v28 }
 0x208   :  { %v391_v53 = vmul.f32 -1.702, %v616_v46  ;;  %v397_v54 = vmul.f32 -1.702, %v618_v47  ;;  %v624_v55 = vadd.f32 %v249_v49, %v139_v28  ;;  %v235_v56 = vpop.f32.mrf.mxu0  ;;  %v251_v57 = vpop.f32.mrf.mxu1 }
 0x209   :  { %454 = vpow2.f32 %v276_v50  ;;  %v392_v58 = vmul.f32 -1.702, %v620_v52  ;;  %v627_v59 = vadd.f32 %v235_v56, %v143_v29  ;;  %v629_v60 = vadd.f32 %v251_v57, %v143_v29 }
 0x20a   :  { %456 = vpow2.f32 %v288_v51  ;;  %v278_v61 = vmul.f32 1.442695, %v391_v53  ;;  %v290_v62 = vmul.f32 1.442695, %v397_v54  ;;  %v398_v63 = vmul.f32 -1.702, %v624_v55  ;;  %v253_v0 = vpop.f32.mrf.mxu1 }
 0x20b   :  { %v280_v1 = vmul.f32 1.442695, %v392_v58  ;;  %v393_v2 = vmul.f32 -1.702, %v627_v59  ;;  %v399_v3 = vmul.f32 -1.702, %v629_v60 }
 0x20c   :  { %458 = vpow2.f32 %v278_v61  ;;  %v292_v4 = vmul.f32 1.442695, %v398_v63  ;;  %v254_v5 = vpop.f32.mrf.mxu1 }
 0x20d   :  { %460 = vpow2.f32 %v290_v62  ;;  %v282_v6 = vmul.f32 1.442695, %v393_v2  ;;  %v294_v7 = vmul.f32 1.442695, %v399_v3 }
 0x20e   :  { %462 = vpow2.f32 %v280_v1 }
 0x20f   :  { %464 = vpow2.f32 %v292_v4 }
 0x210   :  { %466 = vpow2.f32 %v282_v6 }
 0x211   :  { %468 = vpow2.f32 %v294_v7 }
 0x212   :  { %v451_v8 = vpop.eup %450 }
 0x213   :  { %v300_v9 = vadd.f32 1.0, %v451_v8 }
 0x214   :  { %v453_v10 = vpop.eup %452 }
 0x215   :  { %470 = vrcp.f32 %v300_v9  ;;  %v301_v11 = vadd.f32 1.0, %v453_v10 }
 0x216   :  { %v455_v12 = vpop.eup %454 }
 0x217   :  { %v457_v13 = vpop.eup %456  ;;  %472 = vrcp.f32 %v301_v11  ;;  %v296_v14 = vadd.f32 1.0, %v455_v12 }
 0x218   :  { %v302_v15 = vadd.f32 1.0, %v457_v13 }
 0x219   :  { %v459_v16 = vpop.eup %458  ;;  %474 = vrcp.f32 %v296_v14 }
 0x21a   :  { %v461_v17 = vpop.eup %460  ;;  %v297_v19 = vadd.f32 1.0, %v459_v16  ;;  %476 = vrcp.f32 %v302_v15 }
 0x21b   :  { %v463_v20 = vpop.eup %462  ;;  %v303_v18 = vadd.f32 1.0, %v461_v17 }
 0x21c   :  { %v465_v21 = vpop.eup %464  ;;  %478 = vrcp.f32 %v297_v19  ;;  %v298_v22 = vadd.f32 1.0, %v463_v20 }
 0x21d   :  { %v467_v23 = vpop.eup %466  ;;  %480 = vrcp.f32 %v303_v18  ;;  %v304_v24 = vadd.f32 1.0, %v465_v21 }
 0x21e   :  { %v469_v25 = vpop.eup %468  ;;  %482 = vrcp.f32 %v298_v22  ;;  %v299_v26 = vadd.f32 1.0, %v467_v23 }
 0x21f   :  { %484 = vrcp.f32 %v304_v24  ;;  %v305_v27 = vadd.f32 1.0, %v469_v25 }
 0x220   :  { %486 = vrcp.f32 %v299_v26 }
 0x221   :  { %488 = vrcp.f32 %v305_v27 }
 0x222   :  { %v471_v28 = vpop.eup %470 }
 0x223   :  { %v330_v30 = vmul.f32 %v471_v28, %v604_v31 }
 0x224   :  { %v473_v29 = vpop.eup %472 }
 0x225   :  { %v331_v32 = vmul.f32 %v473_v29, %v607_v34 }
 0x226   :  { %v475_v33 = vpop.eup %474 }
 0x227   :  { %v407_v35 = vpack.c.bf16 %v331_v32, %v330_v30  ;;  %v477_v36 = vpop.eup %476  ;;  %v326_v41 = vmul.f32 %v475_v33, %v610_v39 }
 0x228   :  { %v332_v44 = vmul.f32 %v477_v36, %v612_v40 }
 0x229   :  { %v479_v37 = vpop.eup %478  ;;  %370 = vst [vmem:[%s664_s5 + $0x10] sm:$0xff] %v407_v35 }
 0x22a   :  { %v481_v38 = vpop.eup %480  ;;  %v327_v42 = vmul.f32 %v479_v37, %v616_v46 }
 0x22b   :  { %v483_v43 = vpop.eup %482  ;;  %v333_v31 = vmul.f32 %v481_v38, %v618_v47 }
 0x22c   :  { %v485_v45 = vpop.eup %484  ;;  %v405_v34 = vpack.c.bf16 %v327_v42, %v326_v41  ;;  %v328_v51 = vmul.f32 %v483_v43, %v620_v52 }
 0x22d   :  { %v487_v48 = vpop.eup %486  ;;  %v408_v49 = vpack.c.bf16 %v333_v31, %v332_v44  ;;  %v334_v40 = vmul.f32 %v485_v45, %v624_v55 }
 0x22e   :  { %v489_v50 = vpop.eup %488  ;;  %368 = vst [vmem:[%s664_s5] sm:$0xff] %v405_v34  ;;  %v329_v39 = vmul.f32 %v487_v48, %v627_v59 }
 0x22f   :  { %371 = vst [vmem:[%s664_s5 + $0x18] sm:$0xff] %v408_v49  ;;  %v335_v46 = vmul.f32 %v489_v50, %v629_v60 }
 0x230   :  { %v406_v47 = vpack.c.bf16 %v329_v39, %v328_v51 }
 0x231   :  { %v409_v53 = vpack.c.bf16 %v335_v46, %v334_v40 }
 0x232   :  { %369 = vst [vmem:[%s664_s5 + $0x8] sm:$0xff] %v406_v47 }
 0x233   :  { %372 = vst [vmem:[%s664_s5 + $0x20] sm:$0x11] %v409_v53 }

// kernel: clip_vit_forward.29
= control target key start
LH: loop header
LB: loop body
LE: loop exit
PB: predicated region body
PF: predicated region fallthrough
CT: control target
= control target key end

     0   :  { %vm277_vm0 = vcmask 519168   ;;  %vm282_vm1 = vcmask 516096   ;;  %s523_s1 = inlined_call_operand.vmem [shape: bf16[256,64], index: 1, kind: input, shape index: {}]   ;;  %s524_s0 = inlined_call_operand.vmem [shape: bf16[34,256], index: 0, kind: input, shape index: {}]   ;;  %s525_s3 = inlined_call_operand.vmem [shape: bf16[34,64], index: 3, kind: input, shape index: {}]   ;;  %s526_s2 = inlined_call_operand.vmem [shape: f32[1,64], index: 2, kind: input, shape index: {}]   ;;  %s527_s4 = inlined_call_operand.vmem [shape: bf16[34,64], index: 4, kind: output, shape index: {}]  }
   0x1   :  { %v380_v0 = vld [vmem:[%s523_s1 + $0x78] sm:$0xff]   ;;  %v382_v2 = vld [vmem:[%s523_s1 + $0x70] sm:$0xff]   ;;  %v384_v4 = vld [vmem:[%s523_s1 + $0x68] sm:$0xff]  }
   0x2   :  { %v381_v1 = vld [vmem:[%s523_s1 + $0x38] sm:$0xff]   ;;  %330 = vmatprep.subr.bf16.mxu0 %v380_v0  ;;  %364 = vmatprep.subr.bf16.mxu1 %v380_v0  ;;  %v383_v3 = vld [vmem:[%s523_s1 + $0x30] sm:$0xff]   ;;  %v385_v5 = vld [vmem:[%s523_s1 + $0x28] sm:$0xff]  }
   0x3   :  { %331 = vmatpush3.bf16.msra.mxu0 %v381_v1  ;;  %372 = vmatpush3.bf16.msra.mxu1 %v381_v1  ;;  %v386_v6 = vld [vmem:[%s523_s1 + $0x60] sm:$0xff]   ;;  %v388_v8 = vld [vmem:[%s523_s1 + $0x58] sm:$0xff]   ;;  %v390_v10 = vld [vmem:[%s523_s1 + $0x50] sm:$0xff]  }
   0x4   :  { %332 = vmatprep.subr.bf16.mxu0 %v382_v2  ;;  %365 = vmatprep.subr.bf16.mxu1 %v382_v2  ;;  %v387_v7 = vld [vmem:[%s523_s1 + $0x20] sm:$0xff]   ;;  %v389_v9 = vld [vmem:[%s523_s1 + $0x18] sm:$0xff]   ;;  %v391_v13 = vld [vmem:[%s523_s1 + $0x10] sm:$0xff]  }
   0x5   :  { %v398_v11 = vld [vmem:[%s524_s0 + $0x4] ss:$8 sps:$4 sm:$0xff]   ;;  %v401_v12 = vld [vmem:[%s524_s0 + $0x14] ss:$8 sps:$4 sm:$0xff]   ;;  %v396_v19 = vld [vmem:[%s524_s0] ss:$8 sps:$4 sm:$0xff]  }
   0x6   :  { %v392_v14 = vld [vmem:[%s523_s1 + $0x48] sm:$0xff]   ;;  %217 = vmatprep.mubr.bf16.mxu0 %v398_v11  ;;  %225 = vmatprep.mubr.bf16.mxu1 %v401_v12  ;;  %v394_v16 = vld [vmem:[%s523_s1 + $0x40] sm:$0xff]   ;;  %v399_v20 = vld [vmem:[%s524_s0 + $0x10] ss:$8 sps:$4 sm:$0xff]  }
   0x7   :  { %333 = vmatpush3.bf16.msra.mxu0 %v383_v3  ;;  %373 = vmatpush3.bf16.msra.mxu1 %v383_v3  ;;  %v393_v15 = vld [vmem:[%s523_s1 + $0x8] sm:$0xff]   ;;  %v395_v17 = vld [vmem:[%s523_s1] sm:$0xff]   ;;  %v245_v47 = vld [vmem:[%s525_s3 + $0x10] sm:$0x1] }
   0x8   :  { %334 = vmatprep.subr.bf16.mxu0 %v384_v4  ;;  %366 = vmatprep.subr.bf16.mxu1 %v384_v4  ;;  %v22_v18 = vld [vmem:[%s524_s0 + $0x20] sm:$0x11]  ;;  %v329_v26 = vld [vmem:[%s525_s3 + $0x8] sm:$0xff]   ;;  %v250_v56 = vunpack.c.l.bf16 %v245_v47 }
   0x9   :  { %v294_v21 = vcombine.high %v22_v18, %v22_v18  ;;  %v293_v22 = vcombine.low %v22_v18, %v22_v18  ;;  %v322_v25 = vld [vmem:[%s525_s3] sm:$0xff]   ;;  %v327_v33 = vunpack.c.l.bf16 %v329_v26  ;;  %v328_v41 = vunpack.c.h.bf16 %v329_v26 }
   0xa   :  { %v288_v27 = vld [vmem:[%s526_s2] ss:$0 sm:$0xff]  ;;  %v323_v31 = vunpack.c.l.bf16 %v322_v25  ;;  %v324_v39 = vunpack.c.h.bf16 %v322_v25 }
   0xb   :  { %335 = vmatpush3.bf16.msra.mxu0 %v385_v5  ;;  %374 = vmatpush3.bf16.msra.mxu1 %v385_v5 }
   0xc   :  { %336 = vmatprep.subr.bf16.mxu0 %v386_v6  ;;  %367 = vmatprep.subr.bf16.mxu1 %v386_v6 }
   0xf   :  { %337 = vmatpush3.bf16.msra.mxu0 %v387_v7  ;;  %375 = vmatpush3.bf16.msra.mxu1 %v387_v7 }
  0x10   :  { %338 = vmatprep.subr.bf16.mxu0 %v388_v8  ;;  %368 = vmatprep.subr.bf16.mxu1 %v388_v8 }
  0x13   :  { %339 = vmatpush3.bf16.msra.mxu0 %v389_v9  ;;  %376 = vmatpush3.bf16.msra.mxu1 %v389_v9 }
  0x14   :  { %340 = vmatprep.subr.bf16.mxu0 %v390_v10  ;;  %369 = vmatprep.subr.bf16.mxu1 %v390_v10 }
  0x17   :  { %341 = vmatpush3.bf16.msra.mxu0 %v391_v13  ;;  %377 = vmatpush3.bf16.msra.mxu1 %v391_v13 }
  0x18   :  { %342 = vmatprep.subr.bf16.mxu0 %v392_v14  ;;  %370 = vmatprep.subr.bf16.mxu1 %v392_v14 }
  0x1b   :  { %343 = vmatpush3.bf16.msra.mxu0 %v393_v15  ;;  %378 = vmatpush3.bf16.msra.mxu1 %v393_v15 }
  0x1c   :  { %344 = vmatprep.subr.bf16.mxu0 %v394_v16  ;;  %371 = vmatprep.subr.bf16.mxu1 %v394_v16 }
  0x1f   :  { %345 = vmatpush3.bf16.msra.mxu0 %v395_v17  ;;  %379 = vmatpush3.bf16.msra.mxu1 %v395_v17 }
  0x22   :  { %218 = vmatmul.mubr.bf16.vlgmr.msra.gmra.mxu0 %v396_v19  ;;  %226 = vmatmul.mubr.bf16.vlgmr.msra.gmra.mxu1 %v399_v20 }
  0x23   :  { %233 = vmatprep.mubr.bf16.mxu1 %v294_v21 }
  0x2a   :  { %234 = vmatmul.mubr.bf16.gmra.mxu1 %v293_v22 }
  0xe2   :  { %v346_v23 = vpop.f32.mrf.mxu0  ;;  %v352_v24 = vpop.f32.mrf.mxu1 }
  0xe4   :  { %v347_v28 = vpop.f32.mrf.mxu0  ;;  %v353_v29 = vpop.f32.mrf.mxu1 }
  0xe5   :  { %v348_v30 = vadd.f32 %v347_v28, %v346_v23  ;;  %v354_v32 = vadd.f32 %v353_v29, %v352_v24 }
  0xe6   :  { %v349_v34 = vpop.f32.mrf.mxu0  ;;  %v355_v35 = vpop.f32.mrf.mxu1 }
  0xe7   :  { %v220_v36 = vadd.f32 %v348_v30, %v288_v27  ;;  %v228_v37 = vadd.f32 %v354_v32, %v288_v27 }
  0xe8   :  { %v350_v38 = vpop.f32.mrf.mxu0  ;;  %v356_v40 = vpop.f32.mrf.mxu1 }
  0xe9   :  { %v251_v42 = vadd.f32 %v323_v31, %v220_v36  ;;  %v253_v43 = vadd.f32 %v327_v33, %v228_v37  ;;  %v351_v44 = vadd.f32 %v350_v38, %v349_v34  ;;  %v357_v45 = vadd.f32 %v356_v40, %v355_v35 }
  0xea   :  { %v358_v46 = vpop.f32.mrf.mxu1 }
  0xeb   :  { %v316_v48 = vpack.c.bf16 %v251_v42, %v251_v42  ;;  %v318_v49 = vpack.c.bf16 %v253_v43, %v253_v43  ;;  %v223_v50 = vadd.f32 %v351_v44, %v288_v27  ;;  %v231_v51 = vadd.f32 %v357_v45, %v288_v27 }
  0xec   :  { %v359_v52 = vpop.f32.mrf.mxu1 }
  0xed   :  { %278 = vst.msk [vmem:[%s527_s4] sm:$0xf] %vm277_vm0, %v316_v48  ;;  %280 = vst.msk [vmem:[%s527_s4 + $0x8] sm:$0xf] %vm277_vm0, %v318_v49  ;;  %v252_v53 = vadd.f32 %v324_v39, %v223_v50  ;;  %v254_v54 = vadd.f32 %v328_v41, %v231_v51  ;;  %v360_v55 = vadd.f32 %v359_v52, %v358_v46 }
  0xee   :  { %v361_v57 = vpop.f32.mrf.mxu1 }
  0xef   :  { %v317_v58 = vpack.c.bf16 %v252_v53, %v252_v53  ;;  %v319_v59 = vpack.c.bf16 %v254_v54, %v254_v54  ;;  %v236_v60 = vadd.f32 %v360_v55, %v288_v27 }
  0xf0   :  { %v362_v61 = vpop.f32.mrf.mxu1 }
  0xf1   :  { %279 = vst.msk [vmem:[%s527_s4 + $0x4] sm:$0xf] %vm277_vm0, %v317_v58  ;;  %281 = vst.msk [vmem:[%s527_s4 + $0xc] sm:$0xf] %vm277_vm0, %v319_v59  ;;  %v255_v62 = vadd.f32 %v250_v56, %v236_v60 }
  0xf3   :  { %v320_v63 = vpack.c.bf16 %v255_v62, %v255_v62 }
  0xf5   :  { %283 = vst.msk [vmem:[%s527_s4 + $0x10] sm:$0x1] %vm282_vm1, %v320_v63 }

// kernel: clip_vit_forward.45
= control target key start
LH: loop header
LB: loop body
LE: loop exit
PB: predicated region body
PF: predicated region fallthrough
CT: control target
= control target key end

     0   :  { %vm28_vm0 = vcmask 523264   ;;  %vm41_vm1 = vcmask 517120   ;;  %v300_v38 = vmov 0.0   ;;  %vm301_vm2 = vmmov 0   ;;  %s421_s0 = inlined_call_operand.vmem [shape: bf16[34,64], index: 0, kind: input, shape index: {}]   ;;  %s422_s3 = inlined_call_operand.vmem [shape: bf16[64,32], index: 3, kind: input, shape index: {}]   ;;  %s423_s1 = inlined_call_operand.vmem [shape: f32[1,64], index: 1, kind: input, shape index: {}]   ;;  %s424_s2 = inlined_call_operand.vmem [shape: f32[1,64], index: 2, kind: input, shape index: {}]   ;;  %s425_s4 = inlined_call_operand.vmem [shape: f32[34,32], index: 4, kind: output, shape index: {}]  }
   0x1   :  { %v248_v0 = vld [vmem:[%s421_s0 + $0x8] sm:$0xff]   ;;  %v241_v1 = vld [vmem:[%s421_s0] sm:$0xff]   ;;  %v22_v5 = vld [vmem:[%s421_s0 + $0x10] sm:$0x1]  ;;  %276 = vmatprep.subr.bf16.mxu1 %v300_v38  ;;  %256 = vmatprep.subr.bf16.mxu0 %v300_v38  ;;  %vm220_vm3 = vcmask 261120   ;;  %vm225_vm4 = vcmask 254976  }
   0x2   :  { %v246_v2 = vunpack.c.l.bf16 %v248_v0  ;;  %v247_v3 = vunpack.c.h.bf16 %v248_v0  ;;  %v242_v4 = vunpack.c.l.bf16 %v241_v1  ;;  %v243_v6 = vunpack.c.h.bf16 %v241_v1  ;;  %v286_v39 = vld [vmem:[%s422_s3 + $0x18] sm:$0xff]   ;;  %268 = vmatprep.mubr.msk.bf16.mxu1 %vm301_vm2, %v300_v38  ;;  %264 = vmatprep.mubr.msk.bf16.mxu0 %vm301_vm2, %v300_v38  ;;  %v287_v40 = vld [vmem:[%s422_s3 + $0x10] sm:$0xff]   ;;  %v288_v41 = vld [vmem:[%s422_s3 + $0x8] sm:$0xff]  }
   0x3   :  { %v27_v10 = vunpack.c.l.bf16 %v22_v5  ;;  %280 = vmatpush3.bf16.msra.mxu1 %v286_v39  ;;  %257 = vmatpush3.bf16.msra.mxu0 %v286_v39  ;;  %v289_v42 = vld [vmem:[%s422_s3] sm:$0xff]  }
   0x4   :  { %v35_v7 = vsel %vm28_vm0, %v246_v2, 0.0  ;;  %v29_v8 = vsel %vm28_vm0, %v242_v4, 0.0  ;;  %v38_v9 = vsel %vm28_vm0, %v247_v3, 0.0  ;;  %v32_v11 = vsel %vm28_vm0, %v243_v6, 0.0  ;;  %277 = vmatprep.subr.bf16.mxu1 %v300_v38  ;;  %258 = vmatprep.subr.bf16.mxu0 %v300_v38  ;;  %v231_v60 = vld [vmem:[%s423_s1] ss:$0 sm:$0xff] }
   0x5   :  { %36 = vadd.xlane.f32.xlu0 %v35_v7  ;;  %30 = vadd.xlane.f32.xlu1 %v29_v8  ;;  %v42_v12 = vsel %vm41_vm1, %v27_v10, 0.0  ;;  %v232_v1 = vld [vmem:[%s424_s2] ss:$0 sm:$0xff] }
   0x7   :  { %281 = vmatpush3.bf16.msra.mxu1 %v287_v40  ;;  %259 = vmatpush3.bf16.msra.mxu0 %v287_v40 }
   0x8   :  { %278 = vmatprep.subr.bf16.mxu1 %v300_v38  ;;  %260 = vmatprep.subr.bf16.mxu0 %v300_v38 }
   0x9   :  { %39 = vadd.xlane.f32.xlu0 %v38_v9  ;;  %33 = vadd.xlane.f32.xlu1 %v32_v11 }
   0xb   :  { %282 = vmatpush3.bf16.msra.mxu1 %v288_v41  ;;  %261 = vmatpush3.bf16.msra.mxu0 %v288_v41 }
   0xc   :  { %279 = vmatprep.subr.bf16.mxu1 %v300_v38  ;;  %262 = vmatprep.subr.bf16.mxu0 %v300_v38 }
   0xd   :  { %43 = vadd.xlane.f32.xlu0 %v42_v12 }
   0xf   :  { %283 = vmatpush3.bf16.msra.mxu1 %v289_v42  ;;  %263 = vmatpush3.bf16.msra.mxu0 %v289_v42 }
  0x8e   :  { %v37_v13 = vpop.xlane.xlu0 %36  ;;  %v31_v14 = vpop.xlane.xlu1 %30 }
  0x8f   :  { %v48_v15 = vmul.f32 0.015625, %v37_v13  ;;  %v46_v16 = vmul.f32 0.015625, %v31_v14 }
  0x91   :  { %v341_v17 = vsub.f32 %v246_v2, %v48_v15  ;;  %v343_v18 = vsub.f32 %v242_v4, %v46_v16 }
  0x92   :  { %v40_v19 = vpop.xlane.xlu0 %39  ;;  %v34_v20 = vpop.xlane.xlu1 %33 }
  0x93   :  { %v49_v21 = vmul.f32 0.015625, %v40_v19  ;;  %v58_v22 = vmul.f32 %v341_v17, %v341_v17  ;;  %v47_v23 = vmul.f32 0.015625, %v34_v20  ;;  %v56_v24 = vmul.f32 %v343_v18, %v343_v18 }
  0x95   :  { %v349_v25 = vsub.f32 %v247_v3, %v49_v21  ;;  %v67_v26 = vsel %vm28_vm0, %v58_v22, 0.0  ;;  %v352_v27 = vsub.f32 %v243_v6, %v47_v23  ;;  %v61_v31 = vsel %vm28_vm0, %v56_v24, 0.0 }
  0x96   :  { %v44_v28 = vpop.xlane.xlu0 %43  ;;  %68 = vadd.xlane.f32.xlu1 %v67_v26 }
  0x97   :  { %v50_v29 = vmul.f32 0.015625, %v44_v28  ;;  %v59_v30 = vmul.f32 %v349_v25, %v349_v25  ;;  %v57_v32 = vmul.f32 %v352_v27, %v352_v27 }
  0x99   :  { %v359_v33 = vsub.f32 %v27_v10, %v50_v29  ;;  %v70_v34 = vsel %vm28_vm0, %v59_v30, 0.0  ;;  %v64_v36 = vsel %vm28_vm0, %v57_v32, 0.0 }
  0x9a   :  { %71 = vadd.xlane.f32.xlu0 %v70_v34  ;;  %62 = vadd.xlane.f32.xlu1 %v61_v31 }
  0x9b   :  { %v60_v35 = vmul.f32 %v359_v33, %v359_v33 }
  0x9d   :  { %v73_v37 = vsel %vm41_vm1, %v60_v35, 0.0 }
  0x9e   :  { %74 = vadd.xlane.f32.xlu1 %v73_v37  ;;  %65 = vadd.xlane.f32.xlu0 %v64_v36 }
 0x11f   :  { %v69_v43 = vpop.xlane.xlu1 %68 }
 0x120   :  { %v78_v44 = vmul.f32 0.015625, %v69_v43 }
 0x122   :  { %v83_v45 = vadd.f32 1e-05, %v78_v44 }
 0x123   :  { %v72_v46 = vpop.xlane.xlu0 %71  ;;  %v63_v47 = vpop.xlane.xlu1 %62 }
 0x124   :  { %290 = vrsqrt.f32 %v83_v45  ;;  %v79_v48 = vmul.f32 0.015625, %v72_v46  ;;  %v76_v49 = vmul.f32 0.015625, %v63_v47 }
 0x126   :  { %v84_v50 = vadd.f32 1e-05, %v79_v48  ;;  %v81_v51 = vadd.f32 1e-05, %v76_v49 }
 0x127   :  { %v66_v52 = vpop.xlane.xlu0 %65  ;;  %v75_v53 = vpop.xlane.xlu1 %74 }
 0x128   :  { %292 = vrsqrt.f32 %v84_v50  ;;  %v77_v54 = vmul.f32 0.015625, %v66_v52  ;;  %v80_v55 = vmul.f32 0.015625, %v75_v53 }
 0x129   :  { %294 = vrsqrt.f32 %v81_v51 }
 0x12a   :  { %v82_v56 = vadd.f32 1e-05, %v77_v54  ;;  %v85_v57 = vadd.f32 1e-05, %v80_v55 }
 0x12c   :  { %296 = vrsqrt.f32 %v82_v56 }
 0x12d   :  { %298 = vrsqrt.f32 %v85_v57 }
 0x131   :  { %v291_v58 = vpop.eup %290 }
 0x132   :  { %v93_v59 = vmul.f32 %v291_v58, %v341_v17 }
 0x134   :  { %v105_v0 = vmul.f32 %v231_v60, %v93_v59 }
 0x135   :  { %v293_v61 = vpop.eup %292 }
 0x136   :  { %v295_v62 = vpop.eup %294  ;;  %v94_v63 = vmul.f32 %v293_v61, %v349_v25  ;;  %v117_v6 = vadd.f32 %v232_v1, %v105_v0 }
 0x137   :  { %v91_v2 = vmul.f32 %v295_v62, %v343_v18 }
 0x138   :  { %v106_v3 = vmul.f32 %v231_v60, %v94_v63 }
 0x139   :  { %v297_v4 = vpop.eup %296  ;;  %v103_v9 = vmul.f32 %v231_v60, %v91_v2 }
 0x13a   :  { %v299_v5 = vpop.eup %298  ;;  %v118_v7 = vadd.f32 %v232_v1, %v106_v3  ;;  %v92_v8 = vmul.f32 %v297_v4, %v352_v27 }
 0x13b   :  { %v95_v10 = vmul.f32 %v299_v5, %v359_v33  ;;  %v115_v14 = vadd.f32 %v232_v1, %v103_v9 }
 0x13c   :  { %v121_v11 = vpack.c.bf16 %v118_v7, %v117_v6  ;;  %v104_v12 = vmul.f32 %v231_v60, %v92_v8 }
 0x13d   :  { %v107_v13 = vmul.f32 %v231_v60, %v95_v10 }
 0x13e   :  { %269 = vmatmul.mubr.msk.bf16.vlgmr.msra.gmra.mxu1 %vm28_vm0, %v121_v11  ;;  %v116_v15 = vadd.f32 %v232_v1, %v104_v12 }
 0x13f   :  { %272 = vmatprep.mubr.msk.bf16.mxu1 %vm301_vm2, %v300_v38  ;;  %v119_v17 = vadd.f32 %v232_v1, %v107_v13 }
 0x140   :  { %v120_v16 = vpack.c.bf16 %v116_v15, %v115_v14 }
 0x141   :  { %v122_v18 = vpack.c.bf16 %v119_v17, %v119_v17 }
 0x142   :  { %265 = vmatmul.mubr.msk.bf16.vlgmr.msra.gmra.mxu0 %vm28_vm0, %v120_v16 }
 0x146   :  { %273 = vmatmul.mubr.msk.bf16.gmra.mxu1 %vm28_vm0, %v122_v18 }
 0x1fe   :  { %v206_v19 = vpop.f32.mrf.mxu1 }
 0x1ff   :  { %223 = vst.msk [vmem:[%s425_s4 + $0x10] sm:$0xff] %vm220_vm3, %v206_v19 }
 0x200   :  { %v270_v20 = vpop.f32.mrf.mxu1 }
 0x202   :  { %v198_v21 = vpop.f32.mrf.mxu0  ;;  %v209_v22 = vpop.f32.mrf.mxu1 }
 0x203   :  { %221 = vst.msk [vmem:[%s425_s4] sm:$0xff] %vm220_vm3, %v198_v21  ;;  %224 = vst.msk [vmem:[%s425_s4 + $0x18] sm:$0xff] %vm220_vm3, %v209_v22 }
 0x204   :  { %v266_v23 = vpop.f32.mrf.mxu0  ;;  %v271_v24 = vpop.f32.mrf.mxu1 }
 0x206   :  { %v201_v25 = vpop.f32.mrf.mxu0  ;;  %v214_v26 = vpop.f32.mrf.mxu1 }
 0x207   :  { %222 = vst.msk [vmem:[%s425_s4 + $0x8] sm:$0xff] %vm220_vm3, %v201_v25 }
 0x208   :  { %226 = vst.msk [vmem:[%s425_s4 + $0x20] sm:$0x3] %vm225_vm4, %v214_v26  ;;  %v267_v27 = vpop.f32.mrf.mxu0  ;;  %v274_v28 = vpop.f32.mrf.mxu1 }
 0x20a   :  { %v217_v29 = vpop.f32.mrf.mxu1 }
 0x20c   :  { %v275_v30 = vpop.f32.mrf.mxu1 }

</bundles_post_ra>
